<compile_context>
chip_gen: v7x
topology: tpu7x:2x2x1
jax: 0.10.0
libtpu: 0.0.40
codegen_flags: <defaults>
</compile_context>

<pallas_src>
import numpy as np
import jax
import jax.numpy as jnp
from jax.experimental import pallas as pl
from jax.experimental.pallas import tpu as pltpu

T = 100          # bezier parameter samples: linspace(0, 1, 100)
T_SUB = 104      # sublane-aligned padding of the t axis (padded rows repeat t=1)
M_PAD = 8        # max / padded number of inner points per curve
NCP = 6          # control points per coordinate (quintic)
COEF_ROWS = 16   # 6 x-coeffs + 6 y-coeffs + 4 pad rows (sublane aligned)
BB = 128         # curves per grid block (lane axis; multiple of 128 -> dense vst)


def _kernel(n_ref, coef_ref, inner_ref, out_ref):
    # n_ref    : (1,) SMEM scalar-prefetch -- number of valid inner points
    # coef_ref : (COEF_ROWS, BB) VMEM -- power-basis coeffs; rows 0..5 = x, 6..11 = y
    # inner_ref: (2*M_PAD, BB) VMEM   -- rows 0..M_PAD-1 = inner x, M_PAD.. = inner y
    # out_ref  : (1, BB) VMEM         -- per-curve loss, lane dense
    n_inner = n_ref[0]

    # t as a sublane column (T_SUB, 1); padded rows clamp to t=1 so they just
    # duplicate the last curve sample and cannot change the min.
    row = jax.lax.broadcasted_iota(jnp.int32, (T_SUB, 1), 0)
    t = jnp.minimum(row, T - 1).astype(jnp.float32) * jnp.float32(1.0 / (T - 1))

    def horner(base):
        c = [coef_ref[base + k:base + k + 1, :] for k in range(NCP)]   # each (1, BB)
        acc = c[4] + t * c[5]
        for k in (3, 2, 1, 0):
            acc = c[k] + t * acc
        return acc                                                      # (T_SUB, BB)

    bx = horner(0)        # x(t) for all BB curves
    by = horner(NCP)      # y(t) for all BB curves

    total = jnp.zeros((1, BB), jnp.float32)
    for m in range(M_PAD):                            # unrolled, masked by n_inner
        ix = inner_ref[m:m + 1, :]                    # (1, BB)
        iy = inner_ref[M_PAD + m:M_PAD + m + 1, :]    # (1, BB)
        dx = bx - ix
        dy = by - iy
        d2 = dx * dx + dy * dy                        # (T_SUB, BB) squared distances
        mind = jnp.sqrt(jnp.min(d2, axis=0, keepdims=True))   # (1, BB)
        total = total + jnp.where(m < n_inner, mind, 0.0)
    out_ref[...] = total


def _power_coeffs(p0, p1, p2, p3, p4, p5):
    """Degree-5 Bernstein -> power basis; each input is a (B,) vector."""
    c0 = p0
    c1 = 5.0 * (p1 - p0)
    c2 = 10.0 * (p2 - 2.0 * p1 + p0)
    c3 = 10.0 * (p3 - 3.0 * p2 + 3.0 * p1 - p0)
    c4 = 5.0 * (p4 - 4.0 * p3 + 6.0 * p2 - 4.0 * p1 + p0)
    c5 = p5 - 5.0 * p4 + 10.0 * p3 - 10.0 * p2 + 5.0 * p1 - p0
    return jnp.stack([c0, c1, c2, c3, c4, c5], axis=0)   # (6, B)


@jax.jit
def quintic_bezier_loss_batched(ps_b, ctps_b):
    """ps_b: (B, N, 2) points; ctps_b: (B, 8) = [x1, y1, x2, y2, x3, y3, x4, y4]."""
    ps_b = jnp.asarray(ps_b, jnp.float32)
    ctps_b = jnp.asarray(ctps_b, jnp.float32)
    B, N, _ = ps_b.shape
    n_inner = N - 2
    if not (1 <= n_inner <= M_PAD):
        raise ValueError(f"need 1 <= N-2 <= {M_PAD}, got N={N}")

    x0, y0 = ps_b[:, 0, 0], ps_b[:, 0, 1]
    x5, y5 = ps_b[:, -1, 0], ps_b[:, -1, 1]
    cx = _power_coeffs(x0, ctps_b[:, 0], ctps_b[:, 2], ctps_b[:, 4], ctps_b[:, 6], x5)
    cy = _power_coeffs(y0, ctps_b[:, 1], ctps_b[:, 3], ctps_b[:, 5], ctps_b[:, 7], y5)
    coef = jnp.concatenate(
        [cx, cy, jnp.zeros((COEF_ROWS - 2 * NCP, B), jnp.float32)], axis=0)  # (16, B)

    inner = ps_b[:, 1:-1, :]                                                 # (B, M, 2)
    ix = jnp.pad(inner[:, :, 0].T, ((0, M_PAD - n_inner), (0, 0)))           # (M_PAD, B)
    iy = jnp.pad(inner[:, :, 1].T, ((0, M_PAD - n_inner), (0, 0)))
    inner_xy = jnp.concatenate([ix, iy], axis=0)                             # (2*M_PAD, B)

    # Pad the curve (lane) axis to a multiple of BB; padded curves compute
    # garbage that is simply discarded below.
    B_pad = pl.cdiv(B, BB) * BB
    pad = B_pad - B
    coef = jnp.pad(coef, ((0, 0), (0, pad)))
    inner_xy = jnp.pad(inner_xy, ((0, 0), (0, pad)))
    num_blocks = B_pad // BB

    n_arr = jnp.full((1,), n_inner, jnp.int32)

    out = pl.pallas_call(
        _kernel,
        out_shape=jax.ShapeDtypeStruct((num_blocks, BB), jnp.float32),
        grid_spec=pltpu.PrefetchScalarGridSpec(
            num_scalar_prefetch=1,
            grid=(num_blocks,),
            in_specs=[
                pl.BlockSpec((COEF_ROWS, BB), lambda i, n: (0, i)),     # coefficients
                pl.BlockSpec((2 * M_PAD, BB), lambda i, n: (0, i)),     # inner points
            ],
            out_specs=pl.BlockSpec((1, BB), lambda i, n: (i, 0)),
        ),
        compiler_params=pltpu.CompilerParams(
            dimension_semantics=("parallel",)),
    )(n_arr, coef, inner_xy)
    return out.reshape(-1)[:B]                                           # (B,)


def quintic_bezier_loss(ps, ctps):
    """Single-curve loss matching Quintic_Bezier.forward()."""
    ps = jnp.asarray(ps, jnp.float32)
    ctps = jnp.asarray(ctps, jnp.float32)
    return quintic_bezier_loss_batched(ps[None], ctps[None])[0]


def _reference(ps, ctps):
    """Pure NumPy float64 reference mirroring the PyTorch forward (de Casteljau)."""
    ps = np.asarray(ps, dtype=np.float64)
    ctps = np.asarray(ctps, dtype=np.float64)
    x = np.array([ps[0, 0], ctps[0], ctps[2], ctps[4], ctps[6], ps[-1, 0]], np.float64)
    y = np.array([ps[0, 1], ctps[1], ctps[3], ctps[5], ctps[7], ps[-1, 1]], np.float64)
    t = np.linspace(0.0, 1.0, T)

    def bez(pts):
        pts = [np.full_like(t, p) for p in pts]
        while len(pts) > 1:
            pts = [(1 - t) * pts[i] + t * pts[i + 1] for i in range(len(pts) - 1)]
        return pts[0]

    bezier = np.stack([bez(x), bez(y)], axis=1)            # (T, 2)
    inner = ps[1:-1, :]                                     # (M, 2)
    diffs = bezier[None, :, :] - inner[:, None, :]          # (M, T, 2)
    dists = np.sqrt((diffs ** 2).sum(axis=2))               # (M, T)
    return dists.min(axis=1).sum()


if __name__ == "__main__":
    key = jax.random.PRNGKey(0)
    kps, kct = jax.random.split(key)

    B, N = 4, 8   # 4 curves, 8 sample points each -> 6 inner points per curve
    base_t = np.linspace(0.0, 1.0, N).astype(np.float32)
    base = np.stack([base_t * 4.0, np.sin(base_t * np.pi)], axis=1).astype(np.float32)
    ps_batch = base[None] + 0.05 * np.asarray(jax.random.normal(kps, (B, N, 2)), np.float32)

    # ctps: [x1, y1, x2, y2, x3, y3, x4, y4] initial inner control points per curve
    ctps_base = np.array([0.8, 0.6, 1.6, 1.0, 2.4, 1.0, 3.2, 0.6], np.float32)
    ctps_batch = ctps_base[None] + 0.3 * np.asarray(jax.random.normal(kct, (B, 8)), np.float32)

    losses = jax.block_until_ready(quintic_bezier_loss_batched(ps_batch, ctps_batch))

    for b in range(B):
        ref = _reference(ps_batch[b], ctps_batch[b])
        assert np.allclose(np.asarray(losses[b]), ref, rtol=1e-3, atol=1e-3), (b, losses[b], ref)

    single = jax.block_until_ready(quintic_bezier_loss(ps_batch[0], ctps_batch[0]))
    assert np.allclose(np.asarray(single), np.asarray(losses[0]), rtol=1e-5, atol=1e-5), \
        (single, losses[0])

    print("KERNEL_OK")
</pallas_src>

<mosaic_0001>
module attributes {stable_mosaic.version = 11 : i64} {
  func.func @_kernel(%arg0: i32, %arg1: memref<1xi32, #tpu.memory_space<smem>>, %arg2: memref<16x128xf32, #tpu.memory_space<vmem>>, %arg3: memref<16x128xf32, #tpu.memory_space<vmem>>, %arg4: memref<1x128xf32, #tpu.memory_space<vmem>>) attributes {dimension_semantics = [#tpu.dimension_semantics<parallel>], iteration_bounds = array<i64: 1>, scalar_prefetch = 1 : i64, scratch_operands = 0 : i64, tpu.core_type = #tpu.core_type<tc>, window_params = [{transform_indices = @transform_0, window_bounds = array<i64: 16, 128>}, {transform_indices = @transform_1, window_bounds = array<i64: 16, 128>}, {transform_indices = @transform_2, window_bounds = array<i64: 1, 128>}]} {
    %c0 = arith.constant 0 : index
    %0 = memref.load %arg1[%c0] : memref<1xi32, #tpu.memory_space<smem>>
    %1 = tpu.iota {dimensions = array<i32: 0>} : vector<104x1xi32>
    %c99_i32 = arith.constant 99 : i32
    %2 = vector.broadcast %c99_i32 : i32 to vector<104x1xi32>
    %3 = arith.minsi %1, %2 : vector<104x1xi32>
    %4 = arith.sitofp %3 : vector<104x1xi32> to vector<104x1xf32>
    %cst = arith.constant 0.0101010101 : f32
    %5 = vector.broadcast %cst : f32 to vector<104x1xf32>
    %6 = arith.mulf %4, %5 : vector<104x1xf32>
    %c0_0 = arith.constant 0 : index
    %c0_1 = arith.constant 0 : index
    %7 = vector.load %arg2[%c0_0, %c0_1] : memref<16x128xf32, #tpu.memory_space<vmem>>, vector<1x128xf32>
    %c1 = arith.constant 1 : index
    %c0_2 = arith.constant 0 : index
    %8 = vector.load %arg2[%c1, %c0_2] : memref<16x128xf32, #tpu.memory_space<vmem>>, vector<1x128xf32>
    %c2 = arith.constant 2 : index
    %c0_3 = arith.constant 0 : index
    %9 = vector.load %arg2[%c2, %c0_3] : memref<16x128xf32, #tpu.memory_space<vmem>>, vector<1x128xf32>
    %c3 = arith.constant 3 : index
    %c0_4 = arith.constant 0 : index
    %10 = vector.load %arg2[%c3, %c0_4] : memref<16x128xf32, #tpu.memory_space<vmem>>, vector<1x128xf32>
    %c4 = arith.constant 4 : index
    %c0_5 = arith.constant 0 : index
    %11 = vector.load %arg2[%c4, %c0_5] : memref<16x128xf32, #tpu.memory_space<vmem>>, vector<1x128xf32>
    %c5 = arith.constant 5 : index
    %c0_6 = arith.constant 0 : index
    %12 = vector.load %arg2[%c5, %c0_6] : memref<16x128xf32, #tpu.memory_space<vmem>>, vector<1x128xf32>
    %13 = vector.broadcast %6 : vector<104x1xf32> to vector<104x128xf32>
    %14 = vector.broadcast %12 : vector<1x128xf32> to vector<104x128xf32>
    %15 = arith.mulf %13, %14 : vector<104x128xf32>
    %16 = vector.broadcast %11 : vector<1x128xf32> to vector<104x128xf32>
    %17 = arith.addf %16, %15 : vector<104x128xf32>
    %18 = vector.broadcast %6 : vector<104x1xf32> to vector<104x128xf32>
    %19 = arith.mulf %18, %17 : vector<104x128xf32>
    %20 = vector.broadcast %10 : vector<1x128xf32> to vector<104x128xf32>
    %21 = arith.addf %20, %19 : vector<104x128xf32>
    %22 = vector.broadcast %6 : vector<104x1xf32> to vector<104x128xf32>
    %23 = arith.mulf %22, %21 : vector<104x128xf32>
    %24 = vector.broadcast %9 : vector<1x128xf32> to vector<104x128xf32>
    %25 = arith.addf %24, %23 : vector<104x128xf32>
    %26 = vector.broadcast %6 : vector<104x1xf32> to vector<104x128xf32>
    %27 = arith.mulf %26, %25 : vector<104x128xf32>
    %28 = vector.broadcast %8 : vector<1x128xf32> to vector<104x128xf32>
    %29 = arith.addf %28, %27 : vector<104x128xf32>
    %30 = vector.broadcast %6 : vector<104x1xf32> to vector<104x128xf32>
    %31 = arith.mulf %30, %29 : vector<104x128xf32>
    %32 = vector.broadcast %7 : vector<1x128xf32> to vector<104x128xf32>
    %33 = arith.addf %32, %31 : vector<104x128xf32>
    %c6 = arith.constant 6 : index
    %c0_7 = arith.constant 0 : index
    %34 = vector.load %arg2[%c6, %c0_7] : memref<16x128xf32, #tpu.memory_space<vmem>>, vector<1x128xf32>
    %c7 = arith.constant 7 : index
    %c0_8 = arith.constant 0 : index
    %35 = vector.load %arg2[%c7, %c0_8] : memref<16x128xf32, #tpu.memory_space<vmem>>, vector<1x128xf32>
    %c8 = arith.constant 8 : index
    %c0_9 = arith.constant 0 : index
    %36 = vector.load %arg2[%c8, %c0_9] : memref<16x128xf32, #tpu.memory_space<vmem>>, vector<1x128xf32>
    %c9 = arith.constant 9 : index
    %c0_10 = arith.constant 0 : index
    %37 = vector.load %arg2[%c9, %c0_10] : memref<16x128xf32, #tpu.memory_space<vmem>>, vector<1x128xf32>
    %c10 = arith.constant 10 : index
    %c0_11 = arith.constant 0 : index
    %38 = vector.load %arg2[%c10, %c0_11] : memref<16x128xf32, #tpu.memory_space<vmem>>, vector<1x128xf32>
    %c11 = arith.constant 11 : index
    %c0_12 = arith.constant 0 : index
    %39 = vector.load %arg2[%c11, %c0_12] : memref<16x128xf32, #tpu.memory_space<vmem>>, vector<1x128xf32>
    %40 = vector.broadcast %6 : vector<104x1xf32> to vector<104x128xf32>
    %41 = vector.broadcast %39 : vector<1x128xf32> to vector<104x128xf32>
    %42 = arith.mulf %40, %41 : vector<104x128xf32>
    %43 = vector.broadcast %38 : vector<1x128xf32> to vector<104x128xf32>
    %44 = arith.addf %43, %42 : vector<104x128xf32>
    %45 = vector.broadcast %6 : vector<104x1xf32> to vector<104x128xf32>
    %46 = arith.mulf %45, %44 : vector<104x128xf32>
    %47 = vector.broadcast %37 : vector<1x128xf32> to vector<104x128xf32>
    %48 = arith.addf %47, %46 : vector<104x128xf32>
    %49 = vector.broadcast %6 : vector<104x1xf32> to vector<104x128xf32>
    %50 = arith.mulf %49, %48 : vector<104x128xf32>
    %51 = vector.broadcast %36 : vector<1x128xf32> to vector<104x128xf32>
    %52 = arith.addf %51, %50 : vector<104x128xf32>
    %53 = vector.broadcast %6 : vector<104x1xf32> to vector<104x128xf32>
    %54 = arith.mulf %53, %52 : vector<104x128xf32>
    %55 = vector.broadcast %35 : vector<1x128xf32> to vector<104x128xf32>
    %56 = arith.addf %55, %54 : vector<104x128xf32>
    %57 = vector.broadcast %6 : vector<104x1xf32> to vector<104x128xf32>
    %58 = arith.mulf %57, %56 : vector<104x128xf32>
    %59 = vector.broadcast %34 : vector<1x128xf32> to vector<104x128xf32>
    %60 = arith.addf %59, %58 : vector<104x128xf32>
    %cst_13 = arith.constant 0.000000e+00 : f32
    %61 = vector.broadcast %cst_13 : f32 to vector<1x128xf32>
    %c0_14 = arith.constant 0 : index
    %c0_15 = arith.constant 0 : index
    %62 = vector.load %arg3[%c0_14, %c0_15] : memref<16x128xf32, #tpu.memory_space<vmem>>, vector<1x128xf32>
    %c8_16 = arith.constant 8 : index
    %c0_17 = arith.constant 0 : index
    %63 = vector.load %arg3[%c8_16, %c0_17] : memref<16x128xf32, #tpu.memory_space<vmem>>, vector<1x128xf32>
    %64 = vector.broadcast %62 : vector<1x128xf32> to vector<104x128xf32>
    %65 = arith.subf %33, %64 : vector<104x128xf32>
    %66 = vector.broadcast %63 : vector<1x128xf32> to vector<104x128xf32>
    %67 = arith.subf %60, %66 : vector<104x128xf32>
    %68 = arith.mulf %65, %65 : vector<104x128xf32>
    %69 = arith.mulf %67, %67 : vector<104x128xf32>
    %70 = arith.addf %68, %69 : vector<104x128xf32>
    %cst_18 = arith.constant dense<0x7F800000> : vector<128xf32>
    %71 = vector.multi_reduction <minimumf>, %70, %cst_18 [0] : vector<104x128xf32> to vector<128xf32>
    %72 = vector.shape_cast %71 : vector<128xf32> to vector<1x128xf32>
    %73 = math.sqrt %72 : vector<1x128xf32>
    %c0_i32 = arith.constant 0 : i32
    %74 = arith.cmpi sgt, %0, %c0_i32 : i32
    %cst_19 = arith.constant 0.000000e+00 : f32
    %75 = vector.broadcast %cst_19 : f32 to vector<1x128xf32>
    %76 = arith.select %74, %73, %75 : vector<1x128xf32>
    %77 = arith.addf %61, %76 : vector<1x128xf32>
    %c1_20 = arith.constant 1 : index
    %c0_21 = arith.constant 0 : index
    %78 = vector.load %arg3[%c1_20, %c0_21] : memref<16x128xf32, #tpu.memory_space<vmem>>, vector<1x128xf32>
    %c9_22 = arith.constant 9 : index
    %c0_23 = arith.constant 0 : index
    %79 = vector.load %arg3[%c9_22, %c0_23] : memref<16x128xf32, #tpu.memory_space<vmem>>, vector<1x128xf32>
    %80 = vector.broadcast %78 : vector<1x128xf32> to vector<104x128xf32>
    %81 = arith.subf %33, %80 : vector<104x128xf32>
    %82 = vector.broadcast %79 : vector<1x128xf32> to vector<104x128xf32>
    %83 = arith.subf %60, %82 : vector<104x128xf32>
    %84 = arith.mulf %81, %81 : vector<104x128xf32>
    %85 = arith.mulf %83, %83 : vector<104x128xf32>
    %86 = arith.addf %84, %85 : vector<104x128xf32>
    %cst_24 = arith.constant dense<0x7F800000> : vector<128xf32>
    %87 = vector.multi_reduction <minimumf>, %86, %cst_24 [0] : vector<104x128xf32> to vector<128xf32>
    %88 = vector.shape_cast %87 : vector<128xf32> to vector<1x128xf32>
    %89 = math.sqrt %88 : vector<1x128xf32>
    %c1_i32 = arith.constant 1 : i32
    %90 = arith.cmpi sgt, %0, %c1_i32 : i32
    %cst_25 = arith.constant 0.000000e+00 : f32
    %91 = vector.broadcast %cst_25 : f32 to vector<1x128xf32>
    %92 = arith.select %90, %89, %91 : vector<1x128xf32>
    %93 = arith.addf %77, %92 : vector<1x128xf32>
    %c2_26 = arith.constant 2 : index
    %c0_27 = arith.constant 0 : index
    %94 = vector.load %arg3[%c2_26, %c0_27] : memref<16x128xf32, #tpu.memory_space<vmem>>, vector<1x128xf32>
    %c10_28 = arith.constant 10 : index
    %c0_29 = arith.constant 0 : index
    %95 = vector.load %arg3[%c10_28, %c0_29] : memref<16x128xf32, #tpu.memory_space<vmem>>, vector<1x128xf32>
    %96 = vector.broadcast %94 : vector<1x128xf32> to vector<104x128xf32>
    %97 = arith.subf %33, %96 : vector<104x128xf32>
    %98 = vector.broadcast %95 : vector<1x128xf32> to vector<104x128xf32>
    %99 = arith.subf %60, %98 : vector<104x128xf32>
    %100 = arith.mulf %97, %97 : vector<104x128xf32>
    %101 = arith.mulf %99, %99 : vector<104x128xf32>
    %102 = arith.addf %100, %101 : vector<104x128xf32>
    %cst_30 = arith.constant dense<0x7F800000> : vector<128xf32>
    %103 = vector.multi_reduction <minimumf>, %102, %cst_30 [0] : vector<104x128xf32> to vector<128xf32>
    %104 = vector.shape_cast %103 : vector<128xf32> to vector<1x128xf32>
    %105 = math.sqrt %104 : vector<1x128xf32>
    %c2_i32 = arith.constant 2 : i32
    %106 = arith.cmpi sgt, %0, %c2_i32 : i32
    %cst_31 = arith.constant 0.000000e+00 : f32
    %107 = vector.broadcast %cst_31 : f32 to vector<1x128xf32>
    %108 = arith.select %106, %105, %107 : vector<1x128xf32>
    %109 = arith.addf %93, %108 : vector<1x128xf32>
    %c3_32 = arith.constant 3 : index
    %c0_33 = arith.constant 0 : index
    %110 = vector.load %arg3[%c3_32, %c0_33] : memref<16x128xf32, #tpu.memory_space<vmem>>, vector<1x128xf32>
    %c11_34 = arith.constant 11 : index
    %c0_35 = arith.constant 0 : index
    %111 = vector.load %arg3[%c11_34, %c0_35] : memref<16x128xf32, #tpu.memory_space<vmem>>, vector<1x128xf32>
    %112 = vector.broadcast %110 : vector<1x128xf32> to vector<104x128xf32>
    %113 = arith.subf %33, %112 : vector<104x128xf32>
    %114 = vector.broadcast %111 : vector<1x128xf32> to vector<104x128xf32>
    %115 = arith.subf %60, %114 : vector<104x128xf32>
    %116 = arith.mulf %113, %113 : vector<104x128xf32>
    %117 = arith.mulf %115, %115 : vector<104x128xf32>
    %118 = arith.addf %116, %117 : vector<104x128xf32>
    %cst_36 = arith.constant dense<0x7F800000> : vector<128xf32>
    %119 = vector.multi_reduction <minimumf>, %118, %cst_36 [0] : vector<104x128xf32> to vector<128xf32>
    %120 = vector.shape_cast %119 : vector<128xf32> to vector<1x128xf32>
    %121 = math.sqrt %120 : vector<1x128xf32>
    %c3_i32 = arith.constant 3 : i32
    %122 = arith.cmpi sgt, %0, %c3_i32 : i32
    %cst_37 = arith.constant 0.000000e+00 : f32
    %123 = vector.broadcast %cst_37 : f32 to vector<1x128xf32>
    %124 = arith.select %122, %121, %123 : vector<1x128xf32>
    %125 = arith.addf %109, %124 : vector<1x128xf32>
    %c4_38 = arith.constant 4 : index
    %c0_39 = arith.constant 0 : index
    %126 = vector.load %arg3[%c4_38, %c0_39] : memref<16x128xf32, #tpu.memory_space<vmem>>, vector<1x128xf32>
    %c12 = arith.constant 12 : index
    %c0_40 = arith.constant 0 : index
    %127 = vector.load %arg3[%c12, %c0_40] : memref<16x128xf32, #tpu.memory_space<vmem>>, vector<1x128xf32>
    %128 = vector.broadcast %126 : vector<1x128xf32> to vector<104x128xf32>
    %129 = arith.subf %33, %128 : vector<104x128xf32>
    %130 = vector.broadcast %127 : vector<1x128xf32> to vector<104x128xf32>
    %131 = arith.subf %60, %130 : vector<104x128xf32>
    %132 = arith.mulf %129, %129 : vector<104x128xf32>
    %133 = arith.mulf %131, %131 : vector<104x128xf32>
    %134 = arith.addf %132, %133 : vector<104x128xf32>
    %cst_41 = arith.constant dense<0x7F800000> : vector<128xf32>
    %135 = vector.multi_reduction <minimumf>, %134, %cst_41 [0] : vector<104x128xf32> to vector<128xf32>
    %136 = vector.shape_cast %135 : vector<128xf32> to vector<1x128xf32>
    %137 = math.sqrt %136 : vector<1x128xf32>
    %c4_i32 = arith.constant 4 : i32
    %138 = arith.cmpi sgt, %0, %c4_i32 : i32
    %cst_42 = arith.constant 0.000000e+00 : f32
    %139 = vector.broadcast %cst_42 : f32 to vector<1x128xf32>
    %140 = arith.select %138, %137, %139 : vector<1x128xf32>
    %141 = arith.addf %125, %140 : vector<1x128xf32>
    %c5_43 = arith.constant 5 : index
    %c0_44 = arith.constant 0 : index
    %142 = vector.load %arg3[%c5_43, %c0_44] : memref<16x128xf32, #tpu.memory_space<vmem>>, vector<1x128xf32>
    %c13 = arith.constant 13 : index
    %c0_45 = arith.constant 0 : index
    %143 = vector.load %arg3[%c13, %c0_45] : memref<16x128xf32, #tpu.memory_space<vmem>>, vector<1x128xf32>
    %144 = vector.broadcast %142 : vector<1x128xf32> to vector<104x128xf32>
    %145 = arith.subf %33, %144 : vector<104x128xf32>
    %146 = vector.broadcast %143 : vector<1x128xf32> to vector<104x128xf32>
    %147 = arith.subf %60, %146 : vector<104x128xf32>
    %148 = arith.mulf %145, %145 : vector<104x128xf32>
    %149 = arith.mulf %147, %147 : vector<104x128xf32>
    %150 = arith.addf %148, %149 : vector<104x128xf32>
    %cst_46 = arith.constant dense<0x7F800000> : vector<128xf32>
    %151 = vector.multi_reduction <minimumf>, %150, %cst_46 [0] : vector<104x128xf32> to vector<128xf32>
    %152 = vector.shape_cast %151 : vector<128xf32> to vector<1x128xf32>
    %153 = math.sqrt %152 : vector<1x128xf32>
    %c5_i32 = arith.constant 5 : i32
    %154 = arith.cmpi sgt, %0, %c5_i32 : i32
    %cst_47 = arith.constant 0.000000e+00 : f32
    %155 = vector.broadcast %cst_47 : f32 to vector<1x128xf32>
    %156 = arith.select %154, %153, %155 : vector<1x128xf32>
    %157 = arith.addf %141, %156 : vector<1x128xf32>
    %c6_48 = arith.constant 6 : index
    %c0_49 = arith.constant 0 : index
    %158 = vector.load %arg3[%c6_48, %c0_49] : memref<16x128xf32, #tpu.memory_space<vmem>>, vector<1x128xf32>
    %c14 = arith.constant 14 : index
    %c0_50 = arith.constant 0 : index
    %159 = vector.load %arg3[%c14, %c0_50] : memref<16x128xf32, #tpu.memory_space<vmem>>, vector<1x128xf32>
    %160 = vector.broadcast %158 : vector<1x128xf32> to vector<104x128xf32>
    %161 = arith.subf %33, %160 : vector<104x128xf32>
    %162 = vector.broadcast %159 : vector<1x128xf32> to vector<104x128xf32>
    %163 = arith.subf %60, %162 : vector<104x128xf32>
    %164 = arith.mulf %161, %161 : vector<104x128xf32>
    %165 = arith.mulf %163, %163 : vector<104x128xf32>
    %166 = arith.addf %164, %165 : vector<104x128xf32>
    %cst_51 = arith.constant dense<0x7F800000> : vector<128xf32>
    %167 = vector.multi_reduction <minimumf>, %166, %cst_51 [0] : vector<104x128xf32> to vector<128xf32>
    %168 = vector.shape_cast %167 : vector<128xf32> to vector<1x128xf32>
    %169 = math.sqrt %168 : vector<1x128xf32>
    %c6_i32 = arith.constant 6 : i32
    %170 = arith.cmpi sgt, %0, %c6_i32 : i32
    %cst_52 = arith.constant 0.000000e+00 : f32
    %171 = vector.broadcast %cst_52 : f32 to vector<1x128xf32>
    %172 = arith.select %170, %169, %171 : vector<1x128xf32>
    %173 = arith.addf %157, %172 : vector<1x128xf32>
    %c7_53 = arith.constant 7 : index
    %c0_54 = arith.constant 0 : index
    %174 = vector.load %arg3[%c7_53, %c0_54] : memref<16x128xf32, #tpu.memory_space<vmem>>, vector<1x128xf32>
    %c15 = arith.constant 15 : index
    %c0_55 = arith.constant 0 : index
    %175 = vector.load %arg3[%c15, %c0_55] : memref<16x128xf32, #tpu.memory_space<vmem>>, vector<1x128xf32>
    %176 = vector.broadcast %174 : vector<1x128xf32> to vector<104x128xf32>
    %177 = arith.subf %33, %176 : vector<104x128xf32>
    %178 = vector.broadcast %175 : vector<1x128xf32> to vector<104x128xf32>
    %179 = arith.subf %60, %178 : vector<104x128xf32>
    %180 = arith.mulf %177, %177 : vector<104x128xf32>
    %181 = arith.mulf %179, %179 : vector<104x128xf32>
    %182 = arith.addf %180, %181 : vector<104x128xf32>
    %cst_56 = arith.constant dense<0x7F800000> : vector<128xf32>
    %183 = vector.multi_reduction <minimumf>, %182, %cst_56 [0] : vector<104x128xf32> to vector<128xf32>
    %184 = vector.shape_cast %183 : vector<128xf32> to vector<1x128xf32>
    %185 = math.sqrt %184 : vector<1x128xf32>
    %c7_i32 = arith.constant 7 : i32
    %186 = arith.cmpi sgt, %0, %c7_i32 : i32
    %cst_57 = arith.constant 0.000000e+00 : f32
    %187 = vector.broadcast %cst_57 : f32 to vector<1x128xf32>
    %188 = arith.select %186, %185, %187 : vector<1x128xf32>
    %189 = arith.addf %173, %188 : vector<1x128xf32>
    %c0_58 = arith.constant 0 : index
    %c0_59 = arith.constant 0 : index
    %190 = vector.load %arg4[%c0_58, %c0_59] : memref<1x128xf32, #tpu.memory_space<vmem>>, vector<1x128xf32>
    tpu.vector_store %arg4[%c0_58, %c0_59], %189 {strides = array<i32>} : memref<1x128xf32, #tpu.memory_space<vmem>>, vector<1x128xf32>,
    return
  }
  func.func @transform_0(%arg0: i32, %arg1: memref<1xi32, #tpu.memory_space<smem>>) -> (i32, i32) {
    %c0_i32 = arith.constant 0 : i32
    %c0_i32_0 = arith.constant 0 : i32
    return %c0_i32, %arg0 : i32, i32
  }
  func.func @transform_1(%arg0: i32, %arg1: memref<1xi32, #tpu.memory_space<smem>>) -> (i32, i32) {
    %c0_i32 = arith.constant 0 : i32
    %c0_i32_0 = arith.constant 0 : i32
    return %c0_i32, %arg0 : i32, i32
  }
  func.func @transform_2(%arg0: i32, %arg1: memref<1xi32, #tpu.memory_space<smem>>) -> (i32, i32) {
    %c0_i32 = arith.constant 0 : i32
    %c0_i32_0 = arith.constant 0 : i32
    return %arg0, %c0_i32 : i32, i32
  }
}

</mosaic_0001>

<bundles_post_ra>
// kernel: quintic_bezier_loss_batched.1
= control target key start
LH: loop header
LB: loop body
LE: loop exit
PB: predicated region body
PF: predicated region fallthrough
CT: control target
= control target key end

     0   :  { %v14_v0 = vlaneseq  ;;  %s2146_s1 = inlined_call_operand.vmem [shape: f32[16,128], index: 1, kind: input, shape index: {}]   ;;  %s2147_s2 = inlined_call_operand.vmem [shape: f32[16,128], index: 2, kind: input, shape index: {}]   ;;  %s2148_s0 = inlined_call_operand.<no memory space> [shape: s32[1], index: 0, kind: input, shape index: {}]   ;;  %s2149_s3 = inlined_call_operand.vmem [shape: f32[1,128], index: 3, kind: output, shape index: {}]  }
   0x1   :  { %v1253_v25 = vld [vmem:[%s2146_s1 + $0x5] ss:$0 sm:$0xff]  ;;  %v1254_v36 = vld [vmem:[%s2146_s1 + $0x4] ss:$0 sm:$0xff]  ;;  %p500_p0 = scmp.gt.s32.totalorder %s2148_s0, 0  ;;  %p606_p1 = scmp.gt.s32.totalorder %s2148_s0, 1 }
   0x2   :  { %v15_v1 = vshrl.u32 %v14_v0, 7  ;;  %p712_p2 = scmp.gt.s32.totalorder %s2148_s0, 2  ;;  %p818_p3 = scmp.gt.s32.totalorder %s2148_s0, 3 }
   0x3   :  { %s2013_s17 = scalar_select %p500_p0, 1, 0 }
   0x4   :  { %v16_v2 = vadd.s32 8, %v15_v1  ;;  %v17_v3 = vadd.s32 16, %v15_v1  ;;  %v18_v4 = vadd.s32 24, %v15_v1  ;;  %v19_v5 = vadd.s32 32, %v15_v1  ;;  %s2027_s20 = scalar_select %p606_p1, 1, 0 }
   0x5   :  { %v20_v6 = vadd.s32 40, %v15_v1  ;;  %v21_v7 = vadd.s32 48, %v15_v1  ;;  %v22_v8 = vadd.s32 56, %v15_v1  ;;  %v23_v9 = vadd.s32 64, %v15_v1  ;;  %s713_s27 = scalar_select %p712_p2, 1, 0 }
   0x6   :  { %v24_v10 = vadd.s32 72, %v15_v1  ;;  %v25_v11 = vadd.s32 80, %v15_v1  ;;  %v26_v12 = vadd.s32 88, %v15_v1  ;;  %v27_v13 = vadd.s32 96, %v15_v1  ;;  %s819_s30 = scalar_select %p818_p3, 1, 0 }
   0x7   :  { %v54_v14 = vcvt.s32.f32 %v15_v1  ;;  %v55_v15 = vcvt.s32.f32 %v16_v2  ;;  %v56_v16 = vcvt.s32.f32 %v17_v3  ;;  %v57_v17 = vcvt.s32.f32 %v18_v4  ;;  %p924_p4 = scmp.gt.s32.totalorder %s2148_s0, 4  ;;  %p1030_p5 = scmp.gt.s32.totalorder %s2148_s0, 5 }
   0x8   :  { %vm52_vm0 = vcmp.lt.s32.totalorder %v27_v13, 99  ;;  %v58_v18 = vcvt.s32.f32 %v19_v5  ;;  %v59_v19 = vcvt.s32.f32 %v20_v6  ;;  %v60_v20 = vcvt.s32.f32 %v21_v7  ;;  %v1255_v6 = vld [vmem:[%s2146_s1 + $0x3] ss:$0 sm:$0xff]  ;;  %p1136_p6 = scmp.gt.s32.totalorder %s2148_s0, 6  ;;  %p1242_p7 = scmp.gt.s32.totalorder %s2148_s0, 7 }
   0x9   :  { %v53_v21 = vsel %vm52_vm0, %v27_v13, 99  ;;  %v61_v22 = vcvt.s32.f32 %v22_v8  ;;  %v62_v23 = vcvt.s32.f32 %v23_v9  ;;  %v63_v24 = vcvt.s32.f32 %v24_v10  ;;  %s925_s9 = scalar_select %p924_p4, 1, 0 }
   0xa   :  { %v64_v26 = vcvt.s32.f32 %v25_v11  ;;  %v65_v27 = vcvt.s32.f32 %v26_v12  ;;  %v66_v28 = vcvt.s32.f32 %v53_v21  ;;  %v1320_v29 = vmul.f32 0.01010101, %v54_v14  ;;  %s1137_s16 = scalar_select %p1136_p6, 1, 0 }
   0xb   :  { %v1322_v30 = vmul.f32 0.01010101, %v55_v15  ;;  %v1324_v31 = vmul.f32 0.01010101, %v56_v16  ;;  %v1326_v32 = vmul.f32 0.01010101, %v57_v17 }
   0xc   :  { %v1328_v33 = vmul.f32 0.01010101, %v58_v18  ;;  %v1330_v34 = vmul.f32 0.01010101, %v59_v19  ;;  %v1332_v35 = vmul.f32 0.01010101, %v60_v20  ;;  %v90_v37 = vmul.f32 %v1253_v25, %v1320_v29 }
   0xd   :  { %v1338_v38 = vmul.f32 0.01010101, %v61_v22  ;;  %v1340_v39 = vmul.f32 0.01010101, %v62_v23  ;;  %v1342_v40 = vmul.f32 0.01010101, %v63_v24  ;;  %v91_v41 = vmul.f32 %v1253_v25, %v1322_v30 }
   0xe   :  { %v1345_v42 = vmul.f32 0.01010101, %v64_v26  ;;  %v1347_v43 = vmul.f32 0.01010101, %v65_v27  ;;  %v1349_v44 = vmul.f32 0.01010101, %v66_v28  ;;  %v92_v45 = vmul.f32 %v1253_v25, %v1324_v31 }
   0xf   :  { %v93_v46 = vmul.f32 %v1253_v25, %v1326_v32  ;;  %v94_v47 = vmul.f32 %v1253_v25, %v1328_v33  ;;  %v95_v48 = vmul.f32 %v1253_v25, %v1330_v34  ;;  %v96_v49 = vmul.f32 %v1253_v25, %v1332_v35  ;;  %s1243_s19 = scalar_select %p1242_p7, 1, 0 }
  0x10   :  { %v97_v50 = vmul.f32 %v1253_v25, %v1338_v38  ;;  %v98_v51 = vmul.f32 %v1253_v25, %v1340_v39  ;;  %v99_v52 = vmul.f32 %v1253_v25, %v1342_v40  ;;  %v100_v53 = vmul.f32 %v1253_v25, %v1345_v42 }
  0x11   :  { %v101_v54 = vmul.f32 %v1253_v25, %v1347_v43  ;;  %v102_v55 = vmul.f32 %v1253_v25, %v1349_v44  ;;  %v107_v56 = vadd.f32 %v1254_v36, %v90_v37  ;;  %v108_v57 = vadd.f32 %v1254_v36, %v91_v41  ;;  %v1256_v41 = vld [vmem:[%s2146_s1 + $0x2] ss:$0 sm:$0xff] }
  0x12   :  { %v109_v58 = vadd.f32 %v1254_v36, %v92_v45  ;;  %v110_v59 = vadd.f32 %v1254_v36, %v93_v46  ;;  %v111_v60 = vadd.f32 %v1254_v36, %v94_v47  ;;  %v112_v61 = vadd.f32 %v1254_v36, %v95_v48 }
  0x13   :  { %v113_v62 = vadd.f32 %v1254_v36, %v96_v49  ;;  %v114_v63 = vadd.f32 %v1254_v36, %v97_v50  ;;  %v115_v0 = vadd.f32 %v1254_v36, %v98_v51  ;;  %v116_v1 = vadd.f32 %v1254_v36, %v99_v52 }
  0x14   :  { %v117_v2 = vadd.f32 %v1254_v36, %v100_v53  ;;  %v118_v3 = vadd.f32 %v1254_v36, %v101_v54  ;;  %v119_v4 = vadd.f32 %v1254_v36, %v102_v55  ;;  %v120_v5 = vmul.f32 %v107_v56, %v1320_v29 }
  0x15   :  { %v121_v7 = vmul.f32 %v108_v57, %v1322_v30  ;;  %v122_v8 = vmul.f32 %v109_v58, %v1324_v31  ;;  %v123_v9 = vmul.f32 %v110_v59, %v1326_v32  ;;  %v124_v10 = vmul.f32 %v111_v60, %v1328_v33 }
  0x16   :  { %v125_v11 = vmul.f32 %v112_v61, %v1330_v34  ;;  %v126_v12 = vmul.f32 %v113_v62, %v1332_v35  ;;  %v127_v13 = vmul.f32 %v114_v63, %v1338_v38  ;;  %v128_v14 = vmul.f32 %v115_v0, %v1340_v39 }
  0x17   :  { %v129_v15 = vmul.f32 %v116_v1, %v1342_v40  ;;  %v130_v16 = vmul.f32 %v117_v2, %v1345_v42  ;;  %v131_v17 = vmul.f32 %v118_v3, %v1347_v43  ;;  %v132_v18 = vmul.f32 %v119_v4, %v1349_v44 }
  0x18   :  { %v137_v19 = vadd.f32 %v1255_v6, %v120_v5  ;;  %v138_v20 = vadd.f32 %v1255_v6, %v121_v7  ;;  %v139_v21 = vadd.f32 %v1255_v6, %v122_v8  ;;  %v140_v22 = vadd.f32 %v1255_v6, %v123_v9  ;;  %v1257_v9 = vld [vmem:[%s2146_s1 + $0x1] ss:$0 sm:$0xff] }
  0x19   :  { %v141_v23 = vadd.f32 %v1255_v6, %v124_v10  ;;  %v142_v24 = vadd.f32 %v1255_v6, %v125_v11  ;;  %v143_v25 = vadd.f32 %v1255_v6, %v126_v12  ;;  %v144_v26 = vadd.f32 %v1255_v6, %v127_v13 }
  0x1a   :  { %v145_v27 = vadd.f32 %v1255_v6, %v128_v14  ;;  %v146_v28 = vadd.f32 %v1255_v6, %v129_v15  ;;  %v147_v36 = vadd.f32 %v1255_v6, %v130_v16  ;;  %v148_v37 = vadd.f32 %v1255_v6, %v131_v17 }
  0x1b   :  { %v149_v45 = vadd.f32 %v1255_v6, %v132_v18  ;;  %v150_v46 = vmul.f32 %v137_v19, %v1320_v29  ;;  %v151_v47 = vmul.f32 %v138_v20, %v1322_v30  ;;  %v152_v48 = vmul.f32 %v139_v21, %v1324_v31 }
  0x1c   :  { %v153_v49 = vmul.f32 %v140_v22, %v1326_v32  ;;  %v154_v50 = vmul.f32 %v141_v23, %v1328_v33  ;;  %v155_v51 = vmul.f32 %v142_v24, %v1330_v34  ;;  %v156_v52 = vmul.f32 %v143_v25, %v1332_v35 }
  0x1d   :  { %v157_v53 = vmul.f32 %v144_v26, %v1338_v38  ;;  %v158_v54 = vmul.f32 %v145_v27, %v1340_v39  ;;  %v159_v55 = vmul.f32 %v146_v28, %v1342_v40  ;;  %v160_v56 = vmul.f32 %v147_v36, %v1345_v42 }
  0x1e   :  { %v161_v57 = vmul.f32 %v148_v37, %v1347_v43  ;;  %v162_v58 = vmul.f32 %v149_v45, %v1349_v44  ;;  %v167_v59 = vadd.f32 %v1256_v41, %v150_v46  ;;  %v168_v60 = vadd.f32 %v1256_v41, %v151_v47 }
  0x1f   :  { %v169_v61 = vadd.f32 %v1256_v41, %v152_v48  ;;  %v170_v62 = vadd.f32 %v1256_v41, %v153_v49  ;;  %v171_v63 = vadd.f32 %v1256_v41, %v154_v50  ;;  %v172_v0 = vadd.f32 %v1256_v41, %v155_v51  ;;  %v1416_v51 = vld [vmem:[%s2146_s1] ss:$0 sm:$0xff] }
  0x20   :  { %v173_v1 = vadd.f32 %v1256_v41, %v156_v52  ;;  %v174_v2 = vadd.f32 %v1256_v41, %v157_v53  ;;  %v175_v3 = vadd.f32 %v1256_v41, %v158_v54  ;;  %v176_v4 = vadd.f32 %v1256_v41, %v159_v55 }
  0x21   :  { %v177_v5 = vadd.f32 %v1256_v41, %v160_v56  ;;  %v178_v6 = vadd.f32 %v1256_v41, %v161_v57  ;;  %v179_v7 = vadd.f32 %v1256_v41, %v162_v58  ;;  %v180_v8 = vmul.f32 %v167_v59, %v1320_v29 }
  0x22   :  { %v181_v10 = vmul.f32 %v168_v60, %v1322_v30  ;;  %v182_v11 = vmul.f32 %v169_v61, %v1324_v31  ;;  %v183_v12 = vmul.f32 %v170_v62, %v1326_v32  ;;  %v184_v13 = vmul.f32 %v171_v63, %v1328_v33  ;;  %v1259_v62 = vld [vmem:[%s2146_s1 + $0xb] ss:$0 sm:$0xff] }
  0x23   :  { %v185_v14 = vmul.f32 %v172_v0, %v1330_v34  ;;  %v186_v15 = vmul.f32 %v173_v1, %v1332_v35  ;;  %v187_v16 = vmul.f32 %v174_v2, %v1338_v38  ;;  %v188_v17 = vmul.f32 %v175_v3, %v1340_v39 }
  0x24   :  { %v189_v18 = vmul.f32 %v176_v4, %v1342_v40  ;;  %v190_v19 = vmul.f32 %v177_v5, %v1345_v42  ;;  %v191_v20 = vmul.f32 %v178_v6, %v1347_v43  ;;  %v192_v21 = vmul.f32 %v179_v7, %v1349_v44 }
  0x25   :  { %v197_v22 = vadd.f32 %v1257_v9, %v180_v8  ;;  %v198_v23 = vadd.f32 %v1257_v9, %v181_v10  ;;  %v199_v24 = vadd.f32 %v1257_v9, %v182_v11  ;;  %v200_v25 = vadd.f32 %v1257_v9, %v183_v12  ;;  %v1260_v11 = vld [vmem:[%s2146_s1 + $0xa] ss:$0 sm:$0xff] }
  0x26   :  { %v201_v26 = vadd.f32 %v1257_v9, %v184_v13  ;;  %v202_v27 = vadd.f32 %v1257_v9, %v185_v14  ;;  %v203_v28 = vadd.f32 %v1257_v9, %v186_v15  ;;  %v204_v36 = vadd.f32 %v1257_v9, %v187_v16 }
  0x27   :  { %v205_v37 = vadd.f32 %v1257_v9, %v188_v17  ;;  %v206_v41 = vadd.f32 %v1257_v9, %v189_v18  ;;  %v207_v45 = vadd.f32 %v1257_v9, %v190_v19  ;;  %v208_v46 = vadd.f32 %v1257_v9, %v191_v20 }
  0x28   :  { %v209_v47 = vadd.f32 %v1257_v9, %v192_v21  ;;  %v210_v48 = vmul.f32 %v197_v22, %v1320_v29  ;;  %v211_v49 = vmul.f32 %v198_v23, %v1322_v30  ;;  %v212_v50 = vmul.f32 %v199_v24, %v1324_v31 }
  0x29   :  { %v213_v52 = vmul.f32 %v200_v25, %v1326_v32  ;;  %v214_v53 = vmul.f32 %v201_v26, %v1328_v33  ;;  %v215_v54 = vmul.f32 %v202_v27, %v1330_v34  ;;  %v216_v55 = vmul.f32 %v203_v28, %v1332_v35 }
  0x2a   :  { %v217_v56 = vmul.f32 %v204_v36, %v1338_v38  ;;  %v218_v57 = vmul.f32 %v205_v37, %v1340_v39  ;;  %v219_v58 = vmul.f32 %v206_v41, %v1342_v40  ;;  %v220_v59 = vmul.f32 %v207_v45, %v1345_v42 }
  0x2b   :  { %v1427_v60 = vmul.f32 %v208_v46, %v1347_v43  ;;  %v1430_v61 = vmul.f32 %v209_v47, %v1349_v44  ;;  %v1436_v63 = vadd.f32 %v1416_v51, %v210_v48  ;;  %v1439_v0 = vadd.f32 %v1416_v51, %v211_v49  ;;  %v1261_v49 = vld [vmem:[%s2146_s1 + $0x9] ss:$0 sm:$0xff] }
  0x2c   :  { %v1442_v1 = vadd.f32 %v1416_v51, %v212_v50  ;;  %v1445_v2 = vadd.f32 %v1416_v51, %v213_v52  ;;  %v1448_v3 = vadd.f32 %v1416_v51, %v214_v53  ;;  %v1451_v4 = vadd.f32 %v1416_v51, %v215_v54 }
  0x2d   :  { %v1454_v5 = vadd.f32 %v1416_v51, %v216_v55  ;;  %v1457_v6 = vadd.f32 %v1416_v51, %v217_v56  ;;  %v1460_v7 = vadd.f32 %v1416_v51, %v218_v57  ;;  %v1463_v8 = vadd.f32 %v1416_v51, %v219_v58 }
  0x2e   :  { %2200 = vst [vmem:[#allocation4_spill] sm:$0xff] %v1442_v1  ;;  %2201 = vst [vmem:[#allocation5_spill] sm:$0xff] %v1445_v2  ;;  %v1466_v9 = vadd.f32 %v1416_v51, %v220_v59  ;;  %v250_v10 = vmul.f32 %v1259_v62, %v1320_v29  ;;  %v251_v12 = vmul.f32 %v1259_v62, %v1322_v30 }
  0x2f   :  { %2202 = vst [vmem:[#allocation6_spill] sm:$0xff] %v1448_v3  ;;  %2203 = vst [vmem:[#allocation7_spill] sm:$0xff] %v1451_v4  ;;  %v252_v13 = vmul.f32 %v1259_v62, %v1324_v31  ;;  %v253_v14 = vmul.f32 %v1259_v62, %v1326_v32  ;;  %v254_v15 = vmul.f32 %v1259_v62, %v1328_v33 }
  0x30   :  { %2204 = vst [vmem:[#allocation8_spill] sm:$0xff] %v1454_v5  ;;  %2205 = vst [vmem:[#allocation9_spill] sm:$0xff] %v1457_v6  ;;  %v255_v16 = vmul.f32 %v1259_v62, %v1330_v34  ;;  %v256_v17 = vmul.f32 %v1259_v62, %v1332_v35  ;;  %v257_v18 = vmul.f32 %v1259_v62, %v1338_v38 }
  0x31   :  { %2206 = vst [vmem:[#allocation10_spill] sm:$0xff] %v1460_v7  ;;  %2207 = vst [vmem:[#allocation11_spill] sm:$0xff] %v1463_v8  ;;  %v258_v19 = vmul.f32 %v1259_v62, %v1340_v39  ;;  %v259_v20 = vmul.f32 %v1259_v62, %v1342_v40  ;;  %v260_v21 = vmul.f32 %v1259_v62, %v1345_v42 }
  0x32   :  { %2208 = vst [vmem:[#allocation12_spill] sm:$0xff] %v1466_v9  ;;  %v261_v22 = vmul.f32 %v1259_v62, %v1347_v43  ;;  %v262_v23 = vmul.f32 %v1259_v62, %v1349_v44  ;;  %v267_v24 = vadd.f32 %v1260_v11, %v250_v10  ;;  %v268_v25 = vadd.f32 %v1260_v11, %v251_v12 }
  0x33   :  { %v269_v26 = vadd.f32 %v1260_v11, %v252_v13  ;;  %v270_v27 = vadd.f32 %v1260_v11, %v253_v14  ;;  %v271_v28 = vadd.f32 %v1260_v11, %v254_v15  ;;  %v272_v36 = vadd.f32 %v1260_v11, %v255_v16 }
  0x34   :  { %v273_v37 = vadd.f32 %v1260_v11, %v256_v17  ;;  %v274_v41 = vadd.f32 %v1260_v11, %v257_v18  ;;  %v275_v45 = vadd.f32 %v1260_v11, %v258_v19  ;;  %v276_v46 = vadd.f32 %v1260_v11, %v259_v20 }
  0x35   :  { %v277_v47 = vadd.f32 %v1260_v11, %v260_v21  ;;  %v278_v48 = vadd.f32 %v1260_v11, %v261_v22  ;;  %v279_v50 = vadd.f32 %v1260_v11, %v262_v23  ;;  %v280_v52 = vmul.f32 %v267_v24, %v1320_v29 }
  0x36   :  { %v281_v53 = vmul.f32 %v268_v25, %v1322_v30  ;;  %v282_v54 = vmul.f32 %v269_v26, %v1324_v31  ;;  %v283_v55 = vmul.f32 %v270_v27, %v1326_v32  ;;  %v284_v56 = vmul.f32 %v271_v28, %v1328_v33  ;;  %v1262_v28 = vld [vmem:[%s2146_s1 + $0x8] ss:$0 sm:$0xff] }
  0x37   :  { %v285_v57 = vmul.f32 %v272_v36, %v1330_v34  ;;  %v286_v58 = vmul.f32 %v273_v37, %v1332_v35  ;;  %v287_v59 = vmul.f32 %v274_v41, %v1338_v38  ;;  %v288_v62 = vmul.f32 %v275_v45, %v1340_v39 }
  0x38   :  { %v289_v10 = vmul.f32 %v276_v46, %v1342_v40  ;;  %v290_v11 = vmul.f32 %v277_v47, %v1345_v42  ;;  %v291_v12 = vmul.f32 %v278_v48, %v1347_v43  ;;  %v292_v13 = vmul.f32 %v279_v50, %v1349_v44 }
  0x39   :  { %v297_v14 = vadd.f32 %v1261_v49, %v280_v52  ;;  %v298_v15 = vadd.f32 %v1261_v49, %v281_v53  ;;  %v299_v16 = vadd.f32 %v1261_v49, %v282_v54  ;;  %v300_v17 = vadd.f32 %v1261_v49, %v283_v55 }
  0x3a   :  { %v301_v18 = vadd.f32 %v1261_v49, %v284_v56  ;;  %v302_v19 = vadd.f32 %v1261_v49, %v285_v57  ;;  %v303_v20 = vadd.f32 %v1261_v49, %v286_v58  ;;  %v304_v21 = vadd.f32 %v1261_v49, %v287_v59 }
  0x3b   :  { %v305_v22 = vadd.f32 %v1261_v49, %v288_v62  ;;  %v306_v23 = vadd.f32 %v1261_v49, %v289_v10  ;;  %v307_v24 = vadd.f32 %v1261_v49, %v290_v11  ;;  %v308_v25 = vadd.f32 %v1261_v49, %v291_v12 }
  0x3c   :  { %v309_v26 = vadd.f32 %v1261_v49, %v292_v13  ;;  %v310_v27 = vmul.f32 %v297_v14, %v1320_v29  ;;  %v311_v36 = vmul.f32 %v298_v15, %v1322_v30  ;;  %v312_v37 = vmul.f32 %v299_v16, %v1324_v31  ;;  %v1263_v16 = vld [vmem:[%s2146_s1 + $0x7] ss:$0 sm:$0xff] }
  0x3d   :  { %v313_v41 = vmul.f32 %v300_v17, %v1326_v32  ;;  %v314_v45 = vmul.f32 %v301_v18, %v1328_v33  ;;  %v315_v46 = vmul.f32 %v302_v19, %v1330_v34  ;;  %v316_v47 = vmul.f32 %v303_v20, %v1332_v35 }
  0x3e   :  { %v317_v48 = vmul.f32 %v304_v21, %v1338_v38  ;;  %v318_v49 = vmul.f32 %v305_v22, %v1340_v39  ;;  %v319_v50 = vmul.f32 %v306_v23, %v1342_v40  ;;  %v320_v52 = vmul.f32 %v307_v24, %v1345_v42 }
  0x3f   :  { %v321_v53 = vmul.f32 %v308_v25, %v1347_v43  ;;  %v322_v54 = vmul.f32 %v309_v26, %v1349_v44  ;;  %v327_v55 = vadd.f32 %v1262_v28, %v310_v27  ;;  %v328_v56 = vadd.f32 %v1262_v28, %v311_v36 }
  0x40   :  { %v329_v57 = vadd.f32 %v1262_v28, %v312_v37  ;;  %v330_v58 = vadd.f32 %v1262_v28, %v313_v41  ;;  %v331_v59 = vadd.f32 %v1262_v28, %v314_v45  ;;  %v332_v62 = vadd.f32 %v1262_v28, %v315_v46 }
  0x41   :  { %v333_v10 = vadd.f32 %v1262_v28, %v316_v47  ;;  %v334_v11 = vadd.f32 %v1262_v28, %v317_v48  ;;  %v335_v12 = vadd.f32 %v1262_v28, %v318_v49  ;;  %v336_v13 = vadd.f32 %v1262_v28, %v319_v50 }
  0x42   :  { %v337_v14 = vadd.f32 %v1262_v28, %v320_v52  ;;  %v338_v15 = vadd.f32 %v1262_v28, %v321_v53  ;;  %v339_v17 = vadd.f32 %v1262_v28, %v322_v54  ;;  %v340_v18 = vmul.f32 %v327_v55, %v1320_v29 }
  0x43   :  { %v341_v19 = vmul.f32 %v328_v56, %v1322_v30  ;;  %v342_v20 = vmul.f32 %v329_v57, %v1324_v31  ;;  %v343_v21 = vmul.f32 %v330_v58, %v1326_v32  ;;  %v344_v22 = vmul.f32 %v331_v59, %v1328_v33  ;;  %v1264_v59 = vld [vmem:[%s2146_s1 + $0x6] ss:$0 sm:$0xff] }
  0x44   :  { %v345_v23 = vmul.f32 %v332_v62, %v1330_v34  ;;  %v346_v24 = vmul.f32 %v333_v10, %v1332_v35  ;;  %v347_v25 = vmul.f32 %v334_v11, %v1338_v38  ;;  %v348_v26 = vmul.f32 %v335_v12, %v1340_v39 }
  0x45   :  { %v349_v27 = vmul.f32 %v336_v13, %v1342_v40  ;;  %v350_v28 = vmul.f32 %v337_v14, %v1345_v42  ;;  %v351_v36 = vmul.f32 %v338_v15, %v1347_v43  ;;  %v352_v37 = vmul.f32 %v339_v17, %v1349_v44 }
  0x46   :  { %v357_v41 = vadd.f32 %v1263_v16, %v340_v18  ;;  %v358_v45 = vadd.f32 %v1263_v16, %v341_v19  ;;  %v359_v46 = vadd.f32 %v1263_v16, %v342_v20  ;;  %v360_v47 = vadd.f32 %v1263_v16, %v343_v21 }
  0x47   :  { %v361_v48 = vadd.f32 %v1263_v16, %v344_v22  ;;  %v362_v49 = vadd.f32 %v1263_v16, %v345_v23  ;;  %v363_v50 = vadd.f32 %v1263_v16, %v346_v24  ;;  %v364_v52 = vadd.f32 %v1263_v16, %v347_v25  ;;  %v1266_v22 = vld [vmem:[%s2147_s2 + $0x8] ss:$0 sm:$0xff] }
  0x48   :  { %v365_v53 = vadd.f32 %v1263_v16, %v348_v26  ;;  %v366_v54 = vadd.f32 %v1263_v16, %v349_v27  ;;  %v367_v55 = vadd.f32 %v1263_v16, %v350_v28  ;;  %v368_v56 = vadd.f32 %v1263_v16, %v351_v36 }
  0x49   :  { %v369_v57 = vadd.f32 %v1263_v16, %v352_v37  ;;  %v370_v58 = vmul.f32 %v357_v41, %v1320_v29  ;;  %v371_v62 = vmul.f32 %v358_v45, %v1322_v30  ;;  %v372_v10 = vmul.f32 %v359_v46, %v1324_v31 }
  0x4a   :  { %v373_v11 = vmul.f32 %v360_v47, %v1326_v32  ;;  %v374_v12 = vmul.f32 %v361_v48, %v1328_v33  ;;  %v375_v13 = vmul.f32 %v362_v49, %v1330_v34  ;;  %v376_v14 = vmul.f32 %v363_v50, %v1332_v35 }
  0x4b   :  { %v377_v15 = vmul.f32 %v364_v52, %v1338_v38  ;;  %v378_v29 = vmul.f32 %v365_v53, %v1340_v39  ;;  %v379_v16 = vmul.f32 %v366_v54, %v1342_v40  ;;  %v380_v17 = vmul.f32 %v367_v55, %v1345_v42  ;;  %v1265_v38 = vld [vmem:[%s2147_s2] ss:$0 sm:$0xff] }
  0x4c   :  { %v381_v30 = vmul.f32 %v368_v56, %v1347_v43  ;;  %v382_v31 = vmul.f32 %v369_v57, %v1349_v44  ;;  %v1550_v32 = vadd.f32 %v1416_v51, %v1427_v60  ;;  %v1554_v33 = vadd.f32 %v1416_v51, %v1430_v61 }
  0x4d   :  { %v1556_v34 = vadd.f32 %v1264_v59, %v370_v58  ;;  %v1558_v35 = vadd.f32 %v1264_v59, %v371_v62  ;;  %v1563_v39 = vadd.f32 %v1264_v59, %v372_v10  ;;  %v1565_v40 = vadd.f32 %v1264_v59, %v373_v11 }
  0x4e   :  { %2209 = vst [vmem:[#allocation13_spill] sm:$0xff] %v1550_v32  ;;  %2210 = vst [vmem:[#allocation14_spill] sm:$0xff] %v1554_v33  ;;  %v1567_v42 = vadd.f32 %v1264_v59, %v374_v12  ;;  %v1569_v43 = vadd.f32 %v1264_v59, %v375_v13  ;;  %v1571_v44 = vadd.f32 %v1264_v59, %v376_v14 }
  0x4f   :  { %2211 = vst [vmem:[#allocation15_spill] sm:$0xff] %v1556_v34  ;;  %2212 = vst [vmem:[#allocation16_spill] sm:$0xff] %v1558_v35  ;;  %v1573_v51 = vadd.f32 %v1264_v59, %v377_v15  ;;  %v1575_v60 = vadd.f32 %v1264_v59, %v378_v29  ;;  %v1577_v61 = vadd.f32 %v1264_v59, %v379_v16 }
  0x50   :  { %2213 = vst [vmem:[#allocation17_spill] sm:$0xff] %v1563_v39  ;;  %2214 = vst [vmem:[#allocation18_spill] sm:$0xff] %v1565_v40  ;;  %v1579_v18 = vadd.f32 %v1264_v59, %v380_v17  ;;  %v1581_v19 = vadd.f32 %v1264_v59, %v381_v30  ;;  %v1583_v20 = vadd.f32 %v1264_v59, %v382_v31 }
  0x51   :  { %2215 = vst [vmem:[#allocation19_spill] sm:$0xff] %v1567_v42  ;;  %2216 = vst [vmem:[#allocation20_spill] sm:$0xff] %v1569_v43  ;;  %v406_v21 = vsub.f32 %v1436_v63, %v1265_v38  ;;  %v407_v23 = vsub.f32 %v1439_v0, %v1265_v38  ;;  %v408_v24 = vsub.f32 %v1442_v1, %v1265_v38 }
  0x52   :  { %2217 = vst [vmem:[#allocation21_spill] sm:$0xff] %v1571_v44  ;;  %2218 = vst [vmem:[#allocation22_spill] sm:$0xff] %v1573_v51  ;;  %v409_v25 = vsub.f32 %v1445_v2, %v1265_v38  ;;  %v410_v26 = vsub.f32 %v1448_v3, %v1265_v38  ;;  %v411_v27 = vsub.f32 %v1451_v4, %v1265_v38 }
  0x53   :  { %2219 = vst [vmem:[#allocation23_spill] sm:$0xff] %v1575_v60  ;;  %2220 = vst [vmem:[#allocation24_spill] sm:$0xff] %v1577_v61  ;;  %v412_v28 = vsub.f32 %v1454_v5, %v1265_v38  ;;  %v413_v36 = vsub.f32 %v1457_v6, %v1265_v38  ;;  %v414_v37 = vsub.f32 %v1460_v7, %v1265_v38 }
  0x54   :  { %2221 = vst [vmem:[#allocation25_spill] sm:$0xff] %v1579_v18  ;;  %2222 = vst [vmem:[#allocation26_spill] sm:$0xff] %v1581_v19  ;;  %v415_v41 = vsub.f32 %v1463_v8, %v1265_v38  ;;  %v416_v45 = vsub.f32 %v1466_v9, %v1265_v38  ;;  %v417_v46 = vsub.f32 %v1550_v32, %v1265_v38 }
  0x55   :  { %2223 = vst [vmem:[#allocation27_spill] sm:$0xff] %v1583_v20  ;;  %v418_v47 = vsub.f32 %v1554_v33, %v1265_v38  ;;  %v423_v48 = vsub.f32 %v1556_v34, %v1266_v22  ;;  %v424_v49 = vsub.f32 %v1558_v35, %v1266_v22  ;;  %v425_v50 = vsub.f32 %v1563_v39, %v1266_v22 }
  0x56   :  { %v426_v52 = vsub.f32 %v1565_v40, %v1266_v22  ;;  %v427_v53 = vsub.f32 %v1567_v42, %v1266_v22  ;;  %v428_v54 = vsub.f32 %v1569_v43, %v1266_v22  ;;  %v429_v55 = vsub.f32 %v1571_v44, %v1266_v22 }
  0x57   :  { %v430_v56 = vsub.f32 %v1573_v51, %v1266_v22  ;;  %v431_v57 = vsub.f32 %v1575_v60, %v1266_v22  ;;  %v432_v58 = vsub.f32 %v1577_v61, %v1266_v22  ;;  %v433_v59 = vsub.f32 %v1579_v18, %v1266_v22 }
  0x58   :  { %v434_v62 = vsub.f32 %v1581_v19, %v1266_v22  ;;  %v435_v10 = vsub.f32 %v1583_v20, %v1266_v22  ;;  %v436_v11 = vmul.f32 %v406_v21, %v406_v21  ;;  %v437_v12 = vmul.f32 %v407_v23, %v407_v23 }
  0x59   :  { %v438_v13 = vmul.f32 %v408_v24, %v408_v24  ;;  %v439_v14 = vmul.f32 %v409_v25, %v409_v25  ;;  %v440_v15 = vmul.f32 %v410_v26, %v410_v26  ;;  %v441_v29 = vmul.f32 %v411_v27, %v411_v27 }
  0x5a   :  { %v442_v16 = vmul.f32 %v412_v28, %v412_v28  ;;  %v443_v17 = vmul.f32 %v413_v36, %v413_v36  ;;  %v444_v30 = vmul.f32 %v414_v37, %v414_v37  ;;  %v445_v31 = vmul.f32 %v415_v41, %v415_v41 }
  0x5b   :  { %v446_v38 = vmul.f32 %v416_v45, %v416_v45  ;;  %v449_v60 = vmul.f32 %v423_v48, %v423_v48  ;;  %v450_v51 = vmul.f32 %v424_v49, %v424_v49  ;;  %v451_v61 = vmul.f32 %v425_v50, %v425_v50 }
  0x5c   :  { %v452_v44 = vmul.f32 %v426_v52, %v426_v52  ;;  %v453_v18 = vmul.f32 %v427_v53, %v427_v53  ;;  %v454_v43 = vmul.f32 %v428_v54, %v428_v54  ;;  %v455_v19 = vmul.f32 %v429_v55, %v429_v55 }
  0x5d   :  { %v456_v42 = vmul.f32 %v430_v56, %v430_v56  ;;  %v447_v22 = vmul.f32 %v417_v46, %v417_v46  ;;  %v448_v21 = vmul.f32 %v418_v47, %v418_v47  ;;  %v457_v23 = vmul.f32 %v431_v57, %v431_v57 }
  0x5e   :  { %v458_v24 = vmul.f32 %v432_v58, %v432_v58  ;;  %v459_v25 = vmul.f32 %v433_v59, %v433_v59  ;;  %v460_v26 = vmul.f32 %v434_v62, %v434_v62  ;;  %v461_v27 = vmul.f32 %v435_v10, %v435_v10 }
  0x5f   :  { %v462_v28 = vadd.f32 %v449_v60, %v436_v11  ;;  %v463_v36 = vadd.f32 %v450_v51, %v437_v12  ;;  %v464_v37 = vadd.f32 %v451_v61, %v438_v13  ;;  %v465_v41 = vadd.f32 %v452_v44, %v439_v14 }
  0x60   :  { %v466_v45 = vadd.f32 %v453_v18, %v440_v15  ;;  %v467_v48 = vadd.f32 %v454_v43, %v441_v29  ;;  %v468_v49 = vadd.f32 %v455_v19, %v442_v16  ;;  %v469_v50 = vadd.f32 %v456_v42, %v443_v17  ;;  %v1267_v43 = vld [vmem:[%s2147_s2 + $0x1] ss:$0 sm:$0xff]  ;;  %v1268_v18 = vld [vmem:[%s2147_s2 + $0x9] ss:$0 sm:$0xff] }
  0x61   :  { %v470_v52 = vadd.f32 %v457_v23, %v444_v30  ;;  %v471_v54 = vadd.f32 %v458_v24, %v445_v31  ;;  %v472_v55 = vadd.f32 %v459_v25, %v446_v38  ;;  %v473_v56 = vadd.f32 %v460_v26, %v447_v22  ;;  %v2224_v26 = vld [vmem:[#allocation19_spill] sm:$0xff] }
  0x62   :  { %v475_v53 = vmin.f32 %v462_v28, %v466_v45  ;;  %v474_v46 = vadd.f32 %v461_v27, %v448_v21  ;;  %v476_v47 = vmin.f32 %v463_v36, %v467_v48  ;;  %v477_v57 = vmin.f32 %v464_v37, %v468_v49  ;;  %v2225_v28 = vld [vmem:[#allocation20_spill] sm:$0xff]  ;;  %v2226_v37 = vld [vmem:[#allocation21_spill] sm:$0xff]  ;;  %v2227_v45 = vld [vmem:[#allocation22_spill] sm:$0xff] }
  0x63   :  { %v478_v58 = vmin.f32 %v465_v41, %v469_v50  ;;  %v512_v42 = vsub.f32 %v1436_v63, %v1267_v43  ;;  %v513_v19 = vsub.f32 %v1439_v0, %v1267_v43  ;;  %v514_v11 = vsub.f32 %v1442_v1, %v1267_v43  ;;  %v2228_v49 = vld [vmem:[#allocation23_spill] sm:$0xff] }
  0x64   :  { %v479_v59 = vmin.f32 %v475_v53, %v470_v52  ;;  %v480_v62 = vmin.f32 %v476_v47, %v471_v54  ;;  %v481_v10 = vmin.f32 %v477_v57, %v472_v55  ;;  %v515_v12 = vsub.f32 %v1445_v2, %v1267_v43  ;;  %v2229_v52 = vld [vmem:[#allocation24_spill] sm:$0xff]  ;;  %v2230_v54 = vld [vmem:[#allocation25_spill] sm:$0xff] }
  0x65   :  { %v482_v60 = vmin.f32 %v478_v58, %v473_v56  ;;  %v516_v13 = vsub.f32 %v1448_v3, %v1267_v43  ;;  %v517_v14 = vsub.f32 %v1451_v4, %v1267_v43  ;;  %v518_v15 = vsub.f32 %v1454_v5, %v1267_v43  ;;  %v2231_v56 = vld [vmem:[#allocation26_spill] sm:$0xff] }
  0x66   :  { %v483_v51 = vmin.f32 %v479_v59, %v474_v46  ;;  %v519_v29 = vsub.f32 %v1457_v6, %v1267_v43  ;;  %v520_v16 = vsub.f32 %v1460_v7, %v1267_v43  ;;  %v521_v17 = vsub.f32 %v1463_v8, %v1267_v43 }
  0x67   :  { %v485_v61 = vmin.f32 %v481_v10, %v482_v60  ;;  %v522_v30 = vsub.f32 %v1466_v9, %v1267_v43  ;;  %v523_v31 = vsub.f32 %v1550_v32, %v1267_v43  ;;  %v524_v38 = vsub.f32 %v1554_v33, %v1267_v43 }
  0x68   :  { %v484_v44 = vmin.f32 %v483_v51, %v480_v62  ;;  %v529_v22 = vsub.f32 %v1556_v34, %v1268_v18  ;;  %v530_v21 = vsub.f32 %v1558_v35, %v1268_v18  ;;  %v531_v24 = vsub.f32 %v1563_v39, %v1268_v18 }
  0x69   :  { %v532_v25 = vsub.f32 %v1565_v40, %v1268_v18  ;;  %v533_v27 = vsub.f32 %v2224_v26, %v1268_v18  ;;  %v534_v36 = vsub.f32 %v2225_v28, %v1268_v18  ;;  %v535_v41 = vsub.f32 %v2226_v37, %v1268_v18 }
  0x6a   :  { %v1635_v23 = vmin.f32 %v484_v44, %v485_v61  ;;  %v536_v48 = vsub.f32 %v2227_v45, %v1268_v18  ;;  %v537_v50 = vsub.f32 %v2228_v49, %v1268_v18  ;;  %v538_v53 = vsub.f32 %v2229_v52, %v1268_v18 }
  0x6b   :  { %v539_v55 = vsub.f32 %v2230_v54, %v1268_v18  ;;  %v540_v46 = vsub.f32 %v2231_v56, %v1268_v18  ;;  %v541_v47 = vsub.f32 %v1583_v20, %v1268_v18  ;;  %v542_v57 = vmul.f32 %v512_v42, %v512_v42 }
  0x6c   :  { %v543_v58 = vmul.f32 %v513_v19, %v513_v19  ;;  %v544_v59 = vmul.f32 %v514_v11, %v514_v11  ;;  %v545_v62 = vmul.f32 %v515_v12, %v515_v12  ;;  %v546_v10 = vmul.f32 %v516_v13, %v516_v13 }
  0x6d   :  { %v547_v60 = vmul.f32 %v517_v14, %v517_v14  ;;  %v548_v51 = vmul.f32 %v518_v15, %v518_v15  ;;  %v549_v43 = vmul.f32 %v519_v29, %v519_v29  ;;  %v555_v44 = vmul.f32 %v529_v22, %v529_v22 }
  0x6e   :  { %v556_v61 = vmul.f32 %v530_v21, %v530_v21  ;;  %v559_v45 = vmul.f32 %v533_v27, %v533_v27  ;;  %v560_v49 = vmul.f32 %v534_v36, %v534_v36  ;;  %v550_v37 = vmul.f32 %v520_v16, %v520_v16 }
  0x6f   :  { %v551_v52 = vmul.f32 %v521_v17, %v521_v17  ;;  %v552_v28 = vmul.f32 %v522_v30, %v522_v30  ;;  %v553_v54 = vmul.f32 %v523_v31, %v523_v31  ;;  %v557_v26 = vmul.f32 %v531_v24, %v531_v24  ;;  %v1269_v31 = vld [vmem:[%s2147_s2 + $0x2] ss:$0 sm:$0xff] }
  0x70   :  { %v558_v56 = vmul.f32 %v532_v25, %v532_v25  ;;  %v561_v40 = vmul.f32 %v535_v41, %v535_v41  ;;  %v562_v18 = vmul.f32 %v536_v48, %v536_v48  ;;  %v563_v42 = vmul.f32 %v537_v50, %v537_v50 }
  0x71   :  { %v564_v19 = vmul.f32 %v538_v53, %v538_v53  ;;  %v565_v11 = vmul.f32 %v539_v55, %v539_v55  ;;  %v566_v12 = vmul.f32 %v540_v46, %v540_v46  ;;  %v1648_v13 = vadd.f32 %v555_v44, %v542_v57  ;;  %v2234_v44 = vld [vmem:[#allocation20_spill] sm:$0xff] }
  0x72   :  { %v1650_v14 = vadd.f32 %v556_v61, %v543_v58  ;;  %v1652_v15 = vadd.f32 %v559_v45, %v546_v10  ;;  %v1654_v29 = vadd.f32 %v560_v49, %v547_v60  ;;  %v1657_v17 = vmul.f32 %v524_v38, %v524_v38  ;;  %v2232_v10 = vld [vmem:[#allocation18_spill] sm:$0xff]  ;;  %v2239_v45 = vld [vmem:[#allocation25_spill] sm:$0xff] }
  0x73   :  { %v1659_v30 = vmul.f32 %v541_v47, %v541_v47  ;;  %v1664_v22 = vadd.f32 %v557_v26, %v544_v59  ;;  %v1666_v21 = vadd.f32 %v558_v56, %v545_v62  ;;  %v1668_v24 = vadd.f32 %v561_v40, %v548_v51  ;;  %v1270_v40 = vld [vmem:[%s2147_s2 + $0xa] ss:$0 sm:$0xff]  ;;  %v2233_v51 = vld [vmem:[#allocation19_spill] sm:$0xff]  ;;  %v2238_v26 = vld [vmem:[#allocation24_spill] sm:$0xff] }
  0x74   :  { %v1670_v25 = vadd.f32 %v562_v18, %v549_v43  ;;  %v1672_v27 = vadd.f32 %v563_v42, %v550_v37  ;;  %v1674_v36 = vadd.f32 %v564_v19, %v551_v52  ;;  %v1676_v38 = vadd.f32 %v565_v11, %v552_v28  ;;  %v2235_v18 = vld [vmem:[#allocation21_spill] sm:$0xff]  ;;  %v2236_v19 = vld [vmem:[#allocation22_spill] sm:$0xff] }
  0x75   :  { %v1678_v41 = vadd.f32 %v566_v12, %v553_v54  ;;  %v618_v48 = vsub.f32 %v1436_v63, %v1269_v31  ;;  %v619_v37 = vsub.f32 %v1439_v0, %v1269_v31  ;;  %v620_v49 = vsub.f32 %v1442_v1, %v1269_v31  ;;  %v2237_v12 = vld [vmem:[#allocation23_spill] sm:$0xff] }
  0x76   :  { %v621_v28 = vsub.f32 %v1445_v2, %v1269_v31  ;;  %v622_v50 = vsub.f32 %v1448_v3, %v1269_v31  ;;  %v623_v52 = vsub.f32 %v1451_v4, %v1269_v31  ;;  %v624_v53 = vsub.f32 %v1454_v5, %v1269_v31 }
  0x77   :  { %v625_v54 = vsub.f32 %v1457_v6, %v1269_v31  ;;  %v626_v55 = vsub.f32 %v1460_v7, %v1269_v31  ;;  %v627_v56 = vsub.f32 %v1463_v8, %v1269_v31  ;;  %v628_v46 = vsub.f32 %v1466_v9, %v1269_v31 }
  0x78   :  { %v629_v47 = vsub.f32 %v1550_v32, %v1269_v31  ;;  %v630_v57 = vsub.f32 %v1554_v33, %v1269_v31  ;;  %v635_v58 = vsub.f32 %v1556_v34, %v1270_v40  ;;  %v636_v59 = vsub.f32 %v1558_v35, %v1270_v40  ;;  %v2240_v33 = vld [vmem:[#allocation26_spill] sm:$0xff] }
  0x79   :  { %v637_v62 = vsub.f32 %v1563_v39, %v1270_v40  ;;  %v638_v60 = vsub.f32 %v2232_v10, %v1270_v40  ;;  %v639_v43 = vsub.f32 %v2233_v51, %v1270_v40  ;;  %v640_v61 = vsub.f32 %v2234_v44, %v1270_v40 }
  0x7a   :  { %v641_v42 = vsub.f32 %v2235_v18, %v1270_v40  ;;  %v642_v11 = vsub.f32 %v2236_v19, %v1270_v40  ;;  %v643_v16 = vsub.f32 %v2237_v12, %v1270_v40  ;;  %v644_v31 = vsub.f32 %v2238_v26, %v1270_v40 }
  0x7b   :  { %v645_v34 = vsub.f32 %v2239_v45, %v1270_v40  ;;  %v646_v35 = vsub.f32 %v2240_v33, %v1270_v40  ;;  %v647_v39 = vsub.f32 %v1583_v20, %v1270_v40  ;;  %v648_v32 = vmul.f32 %v618_v48, %v618_v48 }
  0x7c   :  { %v649_v10 = vmul.f32 %v619_v37, %v619_v37  ;;  %v650_v9 = vmul.f32 %v620_v49, %v620_v49  ;;  %v651_v51 = vmul.f32 %v621_v28, %v621_v28  ;;  %v652_v8 = vmul.f32 %v622_v50, %v622_v50 }
  0x7d   :  { %v653_v44 = vmul.f32 %v623_v52, %v623_v52  ;;  %v654_v7 = vmul.f32 %v624_v53, %v624_v53  ;;  %v655_v18 = vmul.f32 %v625_v54, %v625_v54  ;;  %v656_v6 = vmul.f32 %v626_v55, %v626_v55 }
  0x7e   :  { %v657_v19 = vmul.f32 %v627_v56, %v627_v56  ;;  %v658_v5 = vmul.f32 %v628_v46, %v628_v46  ;;  %v661_v12 = vmul.f32 %v635_v58, %v635_v58  ;;  %v662_v4 = vmul.f32 %v636_v59, %v636_v59 }
  0x7f   :  { %v663_v26 = vmul.f32 %v637_v62, %v637_v62  ;;  %v664_v3 = vmul.f32 %v638_v60, %v638_v60  ;;  %v665_v45 = vmul.f32 %v639_v43, %v639_v43  ;;  %v659_v2 = vmul.f32 %v629_v47, %v629_v47  ;;  %v2244_v62 = vld [vmem:[#allocation4_spill] sm:$0xff]  ;;  %v2245_v60 = vld [vmem:[#allocation5_spill] sm:$0xff] }
  0x80   :  { %v660_v33 = vmul.f32 %v630_v57, %v630_v57  ;;  %v666_v1 = vmul.f32 %v640_v61, %v640_v61  ;;  %v667_v40 = vmul.f32 %v641_v42, %v641_v42  ;;  %v668_v48 = vmul.f32 %v642_v11, %v642_v11  ;;  %v2248_v42 = vld [vmem:[#allocation8_spill] sm:$0xff]  ;;  %v2249_v11 = vld [vmem:[#allocation9_spill] sm:$0xff] }
  0x81   :  { %v669_v37 = vmul.f32 %v643_v16, %v643_v16  ;;  %v670_v49 = vmul.f32 %v644_v31, %v644_v31  ;;  %v671_v28 = vmul.f32 %v645_v34, %v645_v34  ;;  %v672_v50 = vmul.f32 %v646_v35, %v646_v35  ;;  %v2250_v31 = vld [vmem:[#allocation10_spill] sm:$0xff] }
  0x82   :  { %v673_v52 = vmul.f32 %v647_v39, %v647_v39  ;;  %v674_v53 = vadd.f32 %v661_v12, %v648_v32  ;;  %v675_v54 = vadd.f32 %v662_v4, %v649_v10  ;;  %v676_v55 = vadd.f32 %v663_v26, %v650_v9  ;;  %v1272_v26 = vld [vmem:[%s2147_s2 + $0xb] ss:$0 sm:$0xff] }
  0x83   :  { %v677_v56 = vadd.f32 %v664_v3, %v651_v51  ;;  %v678_v46 = vadd.f32 %v665_v45, %v652_v8  ;;  %v679_v58 = vadd.f32 %v666_v1, %v653_v44  ;;  %v580_v59 = vadd.f32 %v1659_v30, %v1657_v17  ;;  %v2246_v51 = vld [vmem:[#allocation6_spill] sm:$0xff]  ;;  %v2247_v44 = vld [vmem:[#allocation7_spill] sm:$0xff] }
  0x84   :  { %v583_v47 = vmin.f32 %v1664_v22, %v1668_v24  ;;  %v584_v57 = vmin.f32 %v1666_v21, %v1670_v25  ;;  %v2241_v34 = vmin.f32 %v1648_v13, %v1652_v15  ;;  %v2242_v3 = vmin.f32 %v1650_v14, %v1654_v29 }
  0x85   :  { %v680_v1 = vadd.f32 %v667_v40, %v654_v7  ;;  %v681_v8 = vadd.f32 %v668_v48, %v655_v18  ;;  %v682_v9 = vadd.f32 %v669_v37, %v656_v6  ;;  %v683_v32 = vadd.f32 %v670_v49, %v657_v19  ;;  %v1271_v6 = vld [vmem:[%s2147_s2 + $0x3] ss:$0 sm:$0xff]  ;;  %v2251_v37 = vld [vmem:[#allocation11_spill] sm:$0xff] }
  0x86   :  { %v585_v35 = vmin.f32 %v2241_v34, %v1672_v27  ;;  %v586_v4 = vmin.f32 %v2242_v3, %v1674_v36  ;;  %v684_v39 = vadd.f32 %v671_v28, %v658_v5  ;;  %v685_v16 = vadd.f32 %v672_v50, %v659_v2  ;;  %v2252_v28 = vld [vmem:[#allocation12_spill] sm:$0xff]  ;;  %v2258_v34 = vld [vmem:[#allocation18_spill] sm:$0xff]  ;;  %v2259_v3 = vld [vmem:[#allocation19_spill] sm:$0xff] }
  0x87   :  { %v687_v17 = vmin.f32 %v674_v53, %v678_v46  ;;  %v686_v30 = vadd.f32 %v673_v52, %v660_v33  ;;  %v688_v22 = vmin.f32 %v675_v54, %v679_v58  ;;  %v689_v21 = vmin.f32 %v676_v55, %v680_v1  ;;  %v2253_v52 = vld [vmem:[#allocation13_spill] sm:$0xff]  ;;  %v2254_v54 = vld [vmem:[#allocation14_spill] sm:$0xff]  ;;  %v2256_v58 = vld [vmem:[#allocation16_spill] sm:$0xff] }
  0x88   :  { %v690_v24 = vmin.f32 %v677_v56, %v681_v8  ;;  %v1728_v25 = vmin.f32 %v583_v47, %v1676_v38  ;;  %v1731_v13 = vmin.f32 %v584_v57, %v1678_v41  ;;  %v589_v15 = vmin.f32 %v585_v35, %v580_v59  ;;  %v2255_v56 = vld [vmem:[#allocation15_spill] sm:$0xff]  ;;  %v2257_v47 = vld [vmem:[#allocation17_spill] sm:$0xff]  ;;  %v2260_v1 = vld [vmem:[#allocation20_spill] sm:$0xff] }
  0x89   :  { %v691_v14 = vmin.f32 %v687_v17, %v682_v9  ;;  %v1736_v7 = vmin.f32 %v689_v21, %v684_v39  ;;  %v2243_v5 = vrot.slane %v1635_v23, 4  ;;  %v692_v29 = vmin.f32 %v688_v22, %v683_v32  ;;  %v2261_v9 = vld [vmem:[#allocation21_spill] sm:$0xff]  ;;  %v2262_v39 = vld [vmem:[#allocation22_spill] sm:$0xff]  ;;  %v2263_v17 = vld [vmem:[#allocation23_spill] sm:$0xff] }
  0x8a   :  { %v1738_v2 = vmin.f32 %v690_v24, %v685_v16  ;;  %v1745_v36 = vmin.f32 %v589_v15, %v586_v4  ;;  %v724_v41 = vsub.f32 %v1436_v63, %v1271_v6  ;;  %v725_v45 = vsub.f32 %v1439_v0, %v1271_v6  ;;  %v2264_v22 = vld [vmem:[#allocation24_spill] sm:$0xff]  ;;  %v2265_v24 = vld [vmem:[#allocation25_spill] sm:$0xff] }
  0x8b   :  { %v1743_v33 = vmin.f32 %v1635_v23, %v2243_v5  ;;  %v695_v27 = vmin.f32 %v691_v14, %v686_v30  ;;  %v726_v10 = vsub.f32 %v2244_v62, %v1271_v6  ;;  %v727_v23 = vsub.f32 %v2245_v60, %v1271_v6  ;;  %v2266_v14 = vld [vmem:[#allocation26_spill] sm:$0xff] }
  0x8c   :  { %v728_v43 = vsub.f32 %v2246_v51, %v1271_v6  ;;  %v729_v61 = vsub.f32 %v2247_v44, %v1271_v6  ;;  %v730_v19 = vsub.f32 %v2248_v42, %v1271_v6  ;;  %v731_v12 = vsub.f32 %v2249_v11, %v1271_v6 }
  0x8d   :  { %v732_v40 = vsub.f32 %v2250_v31, %v1271_v6  ;;  %v696_v48 = vmin.f32 %v695_v27, %v692_v29  ;;  %v733_v49 = vsub.f32 %v2251_v37, %v1271_v6  ;;  %v734_v50 = vsub.f32 %v2252_v28, %v1271_v6 }
  0x8e   :  { %v735_v53 = vsub.f32 %v2253_v52, %v1271_v6  ;;  %v736_v55 = vsub.f32 %v2254_v54, %v1271_v6  ;;  %v741_v46 = vsub.f32 %v2255_v56, %v1272_v26  ;;  %v742_v59 = vsub.f32 %v2256_v58, %v1272_v26 }
  0x8f   :  { %v743_v57 = vsub.f32 %v2257_v47, %v1272_v26  ;;  %v744_v35 = vsub.f32 %v2258_v34, %v1272_v26  ;;  %v745_v4 = vsub.f32 %v2259_v3, %v1272_v26  ;;  %v746_v8 = vsub.f32 %v2260_v1, %v1272_v26 }
  0x90   :  { %v747_v32 = vsub.f32 %v2261_v9, %v1272_v26  ;;  %v748_v16 = vsub.f32 %v2262_v39, %v1272_v26  ;;  %v749_v30 = vsub.f32 %v2263_v17, %v1272_v26  ;;  %v750_v21 = vsub.f32 %v2264_v22, %v1272_v26 }
  0x91   :  { %v751_v15 = vsub.f32 %v2265_v24, %v1272_v26  ;;  %v752_v6 = vsub.f32 %v2266_v14, %v1272_v26  ;;  %v753_v5 = vsub.f32 %v1583_v20, %v1272_v26  ;;  %v754_v29 = vmul.f32 %v724_v41, %v724_v41 }
  0x92   :  { %v755_v27 = vmul.f32 %v725_v45, %v725_v45  ;;  %v756_v18 = vmul.f32 %v726_v10, %v726_v10  ;;  %v757_v38 = vmul.f32 %v727_v23, %v727_v23  ;;  %v758_v3 = vmul.f32 %v728_v43, %v728_v43 }
  0x93   :  { %v759_v1 = vmul.f32 %v729_v61, %v729_v61  ;;  %v760_v34 = vmul.f32 %v730_v19, %v730_v19  ;;  %v761_v9 = vmul.f32 %v731_v12, %v731_v12  ;;  %v762_v47 = vmul.f32 %v732_v40, %v732_v40 }
  0x94   :  { %v763_v39 = vmul.f32 %v733_v49, %v733_v49  ;;  %v764_v58 = vmul.f32 %v734_v50, %v734_v50  ;;  %v767_v17 = vmul.f32 %v741_v46, %v741_v46  ;;  %v768_v56 = vmul.f32 %v742_v59, %v742_v59 }
  0x95   :  { %v769_v22 = vmul.f32 %v743_v57, %v743_v57  ;;  %v770_v54 = vmul.f32 %v744_v35, %v744_v35  ;;  %v771_v24 = vmul.f32 %v745_v4, %v745_v4  ;;  %v772_v52 = vmul.f32 %v746_v8, %v746_v8 }
  0x96   :  { %v773_v14 = vmul.f32 %v747_v32, %v747_v32  ;;  %v765_v28 = vmul.f32 %v735_v53, %v735_v53  ;;  %v766_v26 = vmul.f32 %v736_v55, %v736_v55  ;;  %v774_v41 = vmul.f32 %v748_v16, %v748_v16 }
  0x97   :  { %v775_v45 = vmul.f32 %v749_v30, %v749_v30  ;;  %v776_v10 = vmul.f32 %v750_v21, %v750_v21  ;;  %v777_v23 = vmul.f32 %v751_v15, %v751_v15  ;;  %v778_v43 = vmul.f32 %v752_v6, %v752_v6 }
  0x98   :  { %v779_v61 = vmul.f32 %v753_v5, %v753_v5  ;;  %v780_v19 = vadd.f32 %v767_v17, %v754_v29  ;;  %v781_v12 = vadd.f32 %v768_v56, %v755_v27  ;;  %v782_v40 = vadd.f32 %v769_v22, %v756_v18  ;;  %v2269_v27 = vld [vmem:[#allocation12_spill] sm:$0xff] }
  0x99   :  { %v783_v49 = vadd.f32 %v770_v54, %v757_v38  ;;  %v784_v50 = vadd.f32 %v771_v24, %v758_v3  ;;  %v785_v46 = vadd.f32 %v772_v52, %v759_v1  ;;  %v786_v59 = vadd.f32 %v773_v14, %v760_v34  ;;  %v1274_v1 = vld [vmem:[%s2147_s2 + $0xc] ss:$0 sm:$0xff] }
  0x9a   :  { %v787_v57 = vadd.f32 %v774_v41, %v761_v9  ;;  %v489_v35 = vrot.slane %v1743_v33, 2  ;;  %v788_v4 = vadd.f32 %v775_v45, %v762_v47  ;;  %v789_v8 = vadd.f32 %v776_v10, %v763_v39  ;;  %v2270_v41 = vld [vmem:[#allocation13_spill] sm:$0xff]  ;;  %v2271_v10 = vld [vmem:[#allocation14_spill] sm:$0xff] }
  0x9b   :  { %v790_v53 = vadd.f32 %v777_v23, %v764_v58  ;;  %v791_v55 = vadd.f32 %v778_v43, %v765_v28  ;;  %v792_v32 = vadd.f32 %v779_v61, %v766_v26  ;;  %v793_v16 = vmin.f32 %v780_v19, %v784_v50  ;;  %v1273_v28 = vld [vmem:[%s2147_s2 + $0x4] ss:$0 sm:$0xff]  ;;  %v2272_v43 = vld [vmem:[#allocation15_spill] sm:$0xff]  ;;  %v2275_v50 = vld [vmem:[#allocation18_spill] sm:$0xff] }
  0x9c   :  { %v794_v30 = vmin.f32 %v781_v12, %v785_v46  ;;  %v795_v21 = vmin.f32 %v782_v40, %v786_v59  ;;  %v2267_v17 = vmin.f32 %v1728_v25, %v1731_v13  ;;  %v2268_v38 = vmin.f32 %v1736_v7, %v1738_v2  ;;  %v2273_v19 = vld [vmem:[#allocation16_spill] sm:$0xff]  ;;  %v2274_v40 = vld [vmem:[#allocation17_spill] sm:$0xff]  ;;  %v2276_v59 = vld [vmem:[#allocation19_spill] sm:$0xff] }
  0x9d   :  { %v796_v54 = vmin.f32 %v783_v49, %v787_v57  ;;  %v797_v56 = vmin.f32 %v793_v16, %v788_v4  ;;  %v1796_v3 = vmin.f32 %v1743_v33, %v489_v35  ;;  %v830_v2 = vsub.f32 %v1436_v63, %v1273_v28  ;;  %v2277_v35 = vld [vmem:[#allocation20_spill] sm:$0xff]  ;;  %v2280_v16 = vld [vmem:[#allocation23_spill] sm:$0xff] }
  0x9e   :  { %v1785_v18 = vmin.f32 %v1745_v36, %v2267_v17  ;;  %v1790_v52 = vmin.f32 %v696_v48, %v2268_v38  ;;  %v798_v47 = vmin.f32 %v794_v30, %v789_v8  ;;  %v799_v58 = vmin.f32 %v795_v21, %v790_v53  ;;  %v2278_v8 = vld [vmem:[#allocation21_spill] sm:$0xff]  ;;  %v2281_v21 = vld [vmem:[#allocation24_spill] sm:$0xff] }
  0x9f   :  { %v800_v34 = vmin.f32 %v796_v54, %v791_v55  ;;  %v801_v25 = vmin.f32 %v797_v56, %v792_v32  ;;  %v831_v9 = vsub.f32 %v1439_v0, %v1273_v28  ;;  %v832_v39 = vsub.f32 %v2244_v62, %v1273_v28  ;;  %v2279_v55 = vld [vmem:[#allocation22_spill] sm:$0xff]  ;;  %v2282_v54 = vld [vmem:[#allocation25_spill] sm:$0xff] }
  0xa0   :  { %v833_v33 = vsub.f32 %v2245_v60, %v1273_v28  ;;  %v834_v22 = vsub.f32 %v2246_v51, %v1273_v28  ;;  %v835_v24 = vsub.f32 %v2247_v44, %v1273_v28  ;;  %v836_v15 = vsub.f32 %v2248_v42, %v1273_v28 }
  0xa1   :  { %v803_v7 = vmin.f32 %v799_v58, %v800_v34  ;;  %v802_v48 = vmin.f32 %v801_v25, %v798_v47  ;;  %v837_v14 = vsub.f32 %v2249_v11, %v1273_v28  ;;  %v838_v5 = vsub.f32 %v2250_v31, %v1273_v28  ;;  %v2283_v47 = vld [vmem:[#allocation26_spill] sm:$0xff] }
  0xa2   :  { %v839_v29 = vsub.f32 %v2251_v37, %v1273_v28  ;;  %v840_v26 = vsub.f32 %v2269_v27, %v1273_v28  ;;  %v841_v45 = vsub.f32 %v2270_v41, %v1273_v28  ;;  %v842_v23 = vsub.f32 %v2271_v10, %v1273_v28 }
  0xa3   :  { %v1811_v6 = vmin.f32 %v802_v48, %v803_v7  ;;  %v847_v61 = vsub.f32 %v2272_v43, %v1274_v1  ;;  %v848_v12 = vsub.f32 %v2273_v19, %v1274_v1  ;;  %v849_v49 = vsub.f32 %v2274_v40, %v1274_v1 }
  0xa4   :  { %v850_v46 = vsub.f32 %v2275_v50, %v1274_v1  ;;  %v851_v57 = vsub.f32 %v2276_v59, %v1274_v1  ;;  %v852_v4 = vsub.f32 %v2277_v35, %v1274_v1  ;;  %v853_v53 = vsub.f32 %v2278_v8, %v1274_v1 }
  0xa5   :  { %v854_v32 = vsub.f32 %v2279_v55, %v1274_v1  ;;  %v855_v30 = vsub.f32 %v2280_v16, %v1274_v1  ;;  %v856_v17 = vsub.f32 %v2281_v21, %v1274_v1  ;;  %v805_v38 = vrot.slane %v1811_v6, 4 }
  0xa6   :  { %v857_v56 = vsub.f32 %v2282_v54, %v1274_v1  ;;  %v858_v58 = vsub.f32 %v2283_v47, %v1274_v1  ;;  %v859_v28 = vsub.f32 %v1583_v20, %v1274_v1  ;;  %v860_v34 = vmul.f32 %v830_v2, %v830_v2 }
  0xa7   :  { %v861_v25 = vmul.f32 %v831_v9, %v831_v9  ;;  %v862_v7 = vmul.f32 %v832_v39, %v832_v39  ;;  %v863_v48 = vmul.f32 %v833_v33, %v833_v33  ;;  %v864_v36 = vmul.f32 %v834_v22, %v834_v22 }
  0xa8   :  { %v865_v13 = vmul.f32 %v835_v24, %v835_v24  ;;  %v866_v8 = vmul.f32 %v836_v15, %v836_v15  ;;  %v867_v55 = vmul.f32 %v837_v14, %v837_v14  ;;  %v868_v35 = vmul.f32 %v838_v5, %v838_v5 }
  0xa9   :  { %v869_v16 = vmul.f32 %v839_v29, %v839_v29  ;;  %v873_v59 = vmul.f32 %v847_v61, %v847_v61  ;;  %v874_v21 = vmul.f32 %v848_v12, %v848_v12  ;;  %v870_v50 = vmul.f32 %v840_v26, %v840_v26 }
  0xaa   :  { %v875_v40 = vmul.f32 %v849_v49, %v849_v49  ;;  %v876_v19 = vmul.f32 %v850_v46, %v850_v46  ;;  %v877_v54 = vmul.f32 %v851_v57, %v851_v57  ;;  %v878_v43 = vmul.f32 %v852_v4, %v852_v4 }
  0xab   :  { %v879_v47 = vmul.f32 %v853_v53, %v853_v53  ;;  %v880_v10 = vmul.f32 %v854_v32, %v854_v32  ;;  %v881_v1 = vmul.f32 %v855_v30, %v855_v30  ;;  %v871_v2 = vmul.f32 %v841_v45, %v841_v45 }
  0xac   :  { %v872_v9 = vmul.f32 %v842_v23, %v842_v23  ;;  %v882_v39 = vmul.f32 %v856_v17, %v856_v17  ;;  %v883_v33 = vmul.f32 %v857_v56, %v857_v56  ;;  %v884_v22 = vmul.f32 %v858_v58, %v858_v58  ;;  %v1276_v56 = vld [vmem:[%s2147_s2 + $0xd] ss:$0 sm:$0xff] }
  0xad   :  { %v885_v24 = vmul.f32 %v859_v28, %v859_v28  ;;  %v886_v15 = vadd.f32 %v873_v59, %v860_v34  ;;  %v887_v14 = vadd.f32 %v874_v21, %v861_v25  ;;  %v888_v5 = vadd.f32 %v875_v40, %v862_v7 }
  0xae   :  { %v889_v29 = vadd.f32 %v876_v19, %v863_v48  ;;  %v890_v61 = vadd.f32 %v877_v54, %v864_v36  ;;  %v891_v12 = vadd.f32 %v878_v43, %v865_v13  ;;  %v892_v26 = vadd.f32 %v879_v47, %v866_v8 }
  0xaf   :  { %v893_v49 = vadd.f32 %v880_v10, %v867_v55  ;;  %v894_v46 = vadd.f32 %v881_v1, %v868_v35  ;;  %v491_v57 = vrot.slane %v1796_v3, 1  ;;  %v2284_v4 = vrot.slane %v1785_v18, 4 }
  0xb0   :  { %v2285_v23 = vrot.slane %v1790_v52, 4  ;;  %v895_v59 = vadd.f32 %v882_v39, %v869_v16  ;;  %v896_v40 = vadd.f32 %v883_v33, %v870_v50  ;;  %v897_v19 = vadd.f32 %v884_v22, %v871_v2  ;;  %v2287_v22 = vld [vmem:[#allocation14_spill] sm:$0xff] }
  0xb1   :  { %v1836_v45 = vmin.f32 %v1785_v18, %v2284_v4  ;;  %v898_v36 = vadd.f32 %v885_v24, %v872_v9  ;;  %v899_v13 = vmin.f32 %v886_v15, %v890_v61  ;;  %v1844_v10 = vmin.f32 %v1811_v6, %v805_v38  ;;  %v2288_v15 = vld [vmem:[#allocation15_spill] sm:$0xff] }
  0xb2   :  { %v1841_v53 = vmin.f32 %v1790_v52, %v2285_v23  ;;  %v900_v43 = vmin.f32 %v887_v14, %v891_v12  ;;  %v901_v35 = vmin.f32 %v888_v5, %v892_v26  ;;  %v902_v8 = vmin.f32 %v889_v29, %v893_v49  ;;  %v1275_v52 = vld [vmem:[%s2147_s2 + $0x5] ss:$0 sm:$0xff]  ;;  %v2290_v12 = vld [vmem:[#allocation17_spill] sm:$0xff]  ;;  %v2291_v49 = vld [vmem:[#allocation18_spill] sm:$0xff] }
  0xb3   :  { %v903_v55 = vmin.f32 %v899_v13, %v894_v46  ;;  %v1850_v16 = vmin.f32 %v1796_v3, %v491_v57  ;;  %v936_v47 = vsub.f32 %v1436_v63, %v1275_v52  ;;  %v937_v58 = vsub.f32 %v1439_v0, %v1275_v52  ;;  %v2289_v29 = vld [vmem:[#allocation16_spill] sm:$0xff]  ;;  %v2292_v57 = vld [vmem:[#allocation19_spill] sm:$0xff] }
  0xb4   :  { %v904_v32 = vmin.f32 %v900_v43, %v895_v59  ;;  %v905_v18 = vmin.f32 %v901_v35, %v896_v40  ;;  %v906_v30 = vmin.f32 %v902_v8, %v897_v19  ;;  %v938_v3 = vsub.f32 %v2244_v62, %v1275_v52  ;;  %v2293_v23 = vld [vmem:[#allocation20_spill] sm:$0xff]  ;;  %v2294_v40 = vld [vmem:[#allocation21_spill] sm:$0xff]  ;;  %v2296_v43 = vld [vmem:[#allocation23_spill] sm:$0xff] }
  0xb5   :  { %2286 = vst [vmem:[#allocation4_spill] sm:$0xff] %v1850_v16  ;;  %v907_v50 = vmin.f32 %v903_v55, %v898_v36  ;;  %v939_v28 = vsub.f32 %v2245_v60, %v1275_v52  ;;  %v940_v34 = vsub.f32 %v2246_v51, %v1275_v52  ;;  %v941_v25 = vsub.f32 %v2247_v44, %v1275_v52  ;;  %v2295_v36 = vld [vmem:[#allocation22_spill] sm:$0xff]  ;;  %v2297_v8 = vld [vmem:[#allocation24_spill] sm:$0xff] }
  0xb6   :  { %v909_v38 = vmin.f32 %v905_v18, %v906_v30  ;;  %v942_v7 = vsub.f32 %v2248_v42, %v1275_v52  ;;  %v943_v1 = vsub.f32 %v2249_v11, %v1275_v52  ;;  %v944_v2 = vsub.f32 %v2250_v31, %v1275_v52  ;;  %v2299_v30 = vld [vmem:[#allocation26_spill] sm:$0xff] }
  0xb7   :  { %v908_v54 = vmin.f32 %v907_v50, %v904_v32  ;;  %v945_v9 = vsub.f32 %v2251_v37, %v1275_v52  ;;  %v946_v39 = vsub.f32 %v2269_v27, %v1275_v52  ;;  %v947_v33 = vsub.f32 %v2270_v41, %v1275_v52  ;;  %v2298_v32 = vld [vmem:[#allocation25_spill] sm:$0xff] }
  0xb8   :  { %v948_v24 = vsub.f32 %v2287_v22, %v1275_v52  ;;  %v953_v14 = vsub.f32 %v2288_v15, %v1276_v56  ;;  %v954_v61 = vsub.f32 %v2289_v29, %v1276_v56  ;;  %v955_v26 = vsub.f32 %v2290_v12, %v1276_v56 }
  0xb9   :  { %v910_v48 = vmin.f32 %v908_v54, %v909_v38  ;;  %v956_v46 = vsub.f32 %v2291_v49, %v1276_v56  ;;  %v957_v4 = vsub.f32 %v2292_v57, %v1276_v56  ;;  %v958_v59 = vsub.f32 %v2293_v23, %v1276_v56 }
  0xba   :  { %v959_v19 = vsub.f32 %v2294_v40, %v1276_v56  ;;  %v960_v13 = vsub.f32 %v2295_v36, %v1276_v56  ;;  %v961_v35 = vsub.f32 %v2296_v43, %v1276_v56  ;;  %v962_v55 = vsub.f32 %v2297_v8, %v1276_v56 }
  0xbb   :  { %v911_v5 = vrot.slane %v910_v48, 4  ;;  %v963_v18 = vsub.f32 %v2298_v32, %v1276_v56  ;;  %v964_v52 = vsub.f32 %v2299_v30, %v1276_v56  ;;  %v965_v50 = vsub.f32 %v1583_v20, %v1276_v56 }
  0xbc   :  { %v966_v38 = vmul.f32 %v936_v47, %v936_v47  ;;  %v967_v54 = vmul.f32 %v937_v58, %v937_v58  ;;  %v968_v17 = vmul.f32 %v938_v3, %v938_v3  ;;  %v969_v21 = vmul.f32 %v939_v28, %v939_v28 }
  0xbd   :  { %v912_v6 = vmin.f32 %v910_v48, %v911_v5  ;;  %v970_v23 = vmul.f32 %v940_v34, %v940_v34  ;;  %v971_v57 = vmul.f32 %v941_v25, %v941_v25  ;;  %v972_v40 = vmul.f32 %v942_v7, %v942_v7 }
  0xbe   :  { %v973_v49 = vmul.f32 %v943_v1, %v943_v1  ;;  %v974_v36 = vmul.f32 %v944_v2, %v944_v2  ;;  %v975_v12 = vmul.f32 %v945_v9, %v945_v9  ;;  %v976_v43 = vmul.f32 %v946_v39, %v946_v39 }
  0xbf   :  { %v979_v29 = vmul.f32 %v953_v14, %v953_v14  ;;  %v980_v8 = vmul.f32 %v954_v61, %v954_v61  ;;  %v981_v15 = vmul.f32 %v955_v26, %v955_v26  ;;  %v982_v32 = vmul.f32 %v956_v46, %v956_v46 }
  0xc0   :  { %v983_v22 = vmul.f32 %v957_v4, %v957_v4  ;;  %v984_v30 = vmul.f32 %v958_v59, %v958_v59  ;;  %v985_v41 = vmul.f32 %v959_v19, %v959_v19  ;;  %v977_v56 = vmul.f32 %v947_v33, %v947_v33 }
  0xc1   :  { %v978_v47 = vmul.f32 %v948_v24, %v948_v24  ;;  %v986_v58 = vmul.f32 %v960_v13, %v960_v13  ;;  %v987_v3 = vmul.f32 %v961_v35, %v961_v35  ;;  %v988_v48 = vmul.f32 %v962_v55, %v962_v55 }
  0xc2   :  { %v989_v28 = vmul.f32 %v963_v18, %v963_v18  ;;  %v990_v34 = vmul.f32 %v964_v52, %v964_v52  ;;  %v991_v25 = vmul.f32 %v965_v50, %v965_v50  ;;  %v992_v7 = vadd.f32 %v979_v29, %v966_v38  ;;  %v1278_v50 = vld [vmem:[%s2147_s2 + $0xe] ss:$0 sm:$0xff] }
  0xc3   :  { %v993_v1 = vadd.f32 %v980_v8, %v967_v54  ;;  %v994_v2 = vadd.f32 %v981_v15, %v968_v17  ;;  %v995_v9 = vadd.f32 %v982_v32, %v969_v21  ;;  %v996_v39 = vadd.f32 %v983_v22, %v970_v23 }
  0xc4   :  { %v997_v14 = vadd.f32 %v984_v30, %v971_v57  ;;  %v998_v5 = vadd.f32 %v985_v41, %v972_v40  ;;  %v999_v61 = vadd.f32 %v986_v58, %v973_v49  ;;  %v2300_v26 = vrot.slane %v1836_v45, 2 }
  0xc5   :  { %v2301_v33 = vrot.slane %v1841_v53, 2  ;;  %v2302_v4 = vrot.slane %v1844_v10, 2  ;;  %v913_v21 = vrot.slane %v912_v6, 2  ;;  %v1000_v17 = vadd.f32 %v987_v3, %v974_v36 }
  0xc6   :  { %v1887_v46 = vmin.f32 %v1836_v45, %v2300_v26  ;;  %v1001_v22 = vadd.f32 %v988_v48, %v975_v12  ;;  %v1002_v41 = vadd.f32 %v989_v28, %v976_v43  ;;  %v1003_v15 = vadd.f32 %v990_v34, %v977_v56  ;;  %v2303_v34 = vld [vmem:[#allocation13_spill] sm:$0xff]  ;;  %v2308_v26 = vld [vmem:[#allocation18_spill] sm:$0xff] }
  0xc7   :  { %v1892_v24 = vmin.f32 %v1841_v53, %v2301_v33  ;;  %v1897_v29 = vmin.f32 %v1844_v10, %v2302_v4  ;;  %v1004_v49 = vadd.f32 %v991_v25, %v978_v47  ;;  %v1005_v57 = vmin.f32 %v992_v7, %v996_v39  ;;  %v1277_v53 = vld [vmem:[%s2147_s2 + $0x6] ss:$0 sm:$0xff]  ;;  %v2304_v7 = vld [vmem:[#allocation14_spill] sm:$0xff] }
  0xc8   :  { %v1006_v23 = vmin.f32 %v993_v1, %v997_v14  ;;  %v1007_v45 = vmin.f32 %v994_v2, %v998_v5  ;;  %v1008_v59 = vmin.f32 %v995_v9, %v999_v61  ;;  %1281 = vrsqrt.f32 %v1850_v16  ;;  %v2305_v2 = vld [vmem:[#allocation15_spill] sm:$0xff]  ;;  %v2306_v39 = vld [vmem:[#allocation16_spill] sm:$0xff]  ;;  %v2307_v5 = vld [vmem:[#allocation17_spill] sm:$0xff] }
  0xc9   :  { %v1009_v40 = vmin.f32 %v1005_v57, %v1000_v17  ;;  %v1906_v35 = vmin.f32 %v912_v6, %v913_v21  ;;  %v1042_v32 = vsub.f32 %v1436_v63, %v1277_v53  ;;  %v1043_v18 = vsub.f32 %v1439_v0, %v1277_v53  ;;  %v2309_v21 = vld [vmem:[#allocation19_spill] sm:$0xff]  ;;  %v2312_v57 = vld [vmem:[#allocation22_spill] sm:$0xff] }
  0xca   :  { %v1010_v19 = vmin.f32 %v1006_v23, %v1001_v22  ;;  %v1011_v13 = vmin.f32 %v1007_v45, %v1002_v41  ;;  %v1012_v36 = vmin.f32 %v1008_v59, %v1003_v15  ;;  %v1044_v30 = vsub.f32 %v2244_v62, %v1277_v53  ;;  %v2310_v22 = vld [vmem:[#allocation20_spill] sm:$0xff]  ;;  %v2311_v15 = vld [vmem:[#allocation21_spill] sm:$0xff]  ;;  %v2313_v45 = vld [vmem:[#allocation23_spill] sm:$0xff] }
  0xcb   :  { %v1013_v8 = vmin.f32 %v1009_v40, %v1004_v49  ;;  %v1045_v38 = vsub.f32 %v2245_v60, %v1277_v53  ;;  %v1046_v54 = vsub.f32 %v2246_v51, %v1277_v53  ;;  %v1047_v6 = vsub.f32 %v2247_v44, %v1277_v53  ;;  %v2314_v40 = vld [vmem:[#allocation24_spill] sm:$0xff] }
  0xcc   :  { %v1015_v55 = vmin.f32 %v1011_v13, %v1012_v36  ;;  %v1048_v56 = vsub.f32 %v2248_v42, %v1277_v53  ;;  %v1049_v47 = vsub.f32 %v2249_v11, %v1277_v53  ;;  %v1050_v58 = vsub.f32 %v2250_v31, %v1277_v53  ;;  %v2315_v13 = vld [vmem:[#allocation25_spill] sm:$0xff] }
  0xcd   :  { %v1014_v52 = vmin.f32 %v1013_v8, %v1010_v19  ;;  %v1051_v3 = vsub.f32 %v2251_v37, %v1277_v53  ;;  %v1052_v28 = vsub.f32 %v2269_v27, %v1277_v53  ;;  %v1053_v25 = vsub.f32 %v2303_v34, %v1277_v53  ;;  %v2316_v8 = vld [vmem:[#allocation26_spill] sm:$0xff] }
  0xce   :  { %v1054_v1 = vsub.f32 %v2304_v7, %v1277_v53  ;;  %v1059_v9 = vsub.f32 %v2305_v2, %v1278_v50  ;;  %v1060_v14 = vsub.f32 %v2306_v39, %v1278_v50  ;;  %v1061_v61 = vsub.f32 %v2307_v5, %v1278_v50 }
  0xcf   :  { %v1016_v48 = vmin.f32 %v1014_v52, %v1015_v55  ;;  %v1062_v33 = vsub.f32 %v2308_v26, %v1278_v50  ;;  %v1063_v17 = vsub.f32 %v2309_v21, %v1278_v50  ;;  %v1064_v41 = vsub.f32 %v2310_v22, %v1278_v50 }
  0xd0   :  { %v1065_v49 = vsub.f32 %v2311_v15, %v1278_v50  ;;  %v1066_v23 = vsub.f32 %v2312_v57, %v1278_v50  ;;  %v1067_v59 = vsub.f32 %v2313_v45, %v1278_v50  ;;  %v1068_v19 = vsub.f32 %v2314_v40, %v1278_v50 }
  0xd1   :  { %v1017_v4 = vrot.slane %v1016_v48, 4  ;;  %v1069_v53 = vsub.f32 %v2315_v13, %v1278_v50  ;;  %v1070_v55 = vsub.f32 %v2316_v8, %v1278_v50  ;;  %v1071_v52 = vsub.f32 %v1583_v20, %v1278_v50 }
  0xd2   :  { %v1072_v43 = vmul.f32 %v1042_v32, %v1042_v32  ;;  %v1937_v12 = vpop.eup %1281  ;;  %v1073_v10 = vmul.f32 %v1043_v18, %v1043_v18  ;;  %v1074_v16 = vmul.f32 %v1044_v30, %v1044_v30  ;;  %v1075_v22 = vmul.f32 %v1045_v38, %v1045_v38 }
  0xd3   :  { %v1018_v36 = vmin.f32 %v1016_v48, %v1017_v4  ;;  %2317 = vst [vmem:[#allocation5_spill] sm:$0xff] %v1937_v12  ;;  %v1076_v15 = vmul.f32 %v1046_v54, %v1046_v54  ;;  %v1077_v21 = vmul.f32 %v1047_v6, %v1047_v6  ;;  %v1078_v57 = vmul.f32 %v1048_v56, %v1048_v56 }
  0xd4   :  { %v1079_v26 = vmul.f32 %v1049_v47, %v1049_v47  ;;  %v1080_v45 = vmul.f32 %v1050_v58, %v1050_v58  ;;  %v1081_v40 = vmul.f32 %v1051_v3, %v1051_v3  ;;  %v1085_v39 = vmul.f32 %v1059_v9, %v1059_v9 }
  0xd5   :  { %v1019_v5 = vrot.slane %v1018_v36, 2  ;;  %v1086_v13 = vmul.f32 %v1060_v14, %v1060_v14  ;;  %v1082_v48 = vmul.f32 %v1052_v28, %v1052_v28  ;;  %v1087_v4 = vmul.f32 %v1061_v61, %v1061_v61 }
  0xd6   :  { %v1088_v8 = vmul.f32 %v1062_v33, %v1062_v33  ;;  %v1089_v2 = vmul.f32 %v1063_v17, %v1063_v17  ;;  %v1090_v50 = vmul.f32 %v1064_v41, %v1064_v41  ;;  %v1091_v32 = vmul.f32 %v1065_v49, %v1065_v49 }
  0xd7   :  { %v1092_v20 = vmul.f32 %v1066_v23, %v1066_v23  ;;  %v1093_v12 = vmul.f32 %v1067_v59, %v1067_v59  ;;  %v1083_v18 = vmul.f32 %v1053_v25, %v1053_v25  ;;  %v1084_v30 = vmul.f32 %v1054_v1, %v1054_v1 }
  0xd8   :  { %v1094_v38 = vmul.f32 %v1068_v19, %v1068_v19  ;;  %v1095_v54 = vmul.f32 %v1069_v53, %v1069_v53  ;;  %v1096_v6 = vmul.f32 %v1070_v55, %v1070_v55  ;;  %v1097_v56 = vmul.f32 %v1071_v52, %v1071_v52  ;;  %v1280_v53 = vld [vmem:[%s2147_s2 + $0xf] ss:$0 sm:$0xff] }
  0xd9   :  { %v1098_v47 = vadd.f32 %v1085_v39, %v1072_v43  ;;  %v1099_v58 = vadd.f32 %v1086_v13, %v1073_v10  ;;  %v1100_v7 = vadd.f32 %v1087_v4, %v1074_v16  ;;  %v1101_v3 = vadd.f32 %v1088_v8, %v1075_v22 }
  0xda   :  { %v1102_v9 = vadd.f32 %v1089_v2, %v1076_v15  ;;  %v1103_v14 = vadd.f32 %v1090_v50, %v1077_v21  ;;  %v2318_v28 = vrot.slane %v1887_v46, 1  ;;  %v1104_v33 = vadd.f32 %v1091_v32, %v1078_v57 }
  0xdb   :  { %v1105_v17 = vadd.f32 %v1092_v20, %v1079_v26  ;;  %v1106_v41 = vadd.f32 %v1093_v12, %v1080_v45  ;;  %v2319_v25 = vrot.slane %v1892_v24, 1  ;;  %v2320_v43 = vrot.slane %v1897_v29, 1 }
  0xdc   :  { %v1942_v61 = vmin.f32 %v1887_v46, %v2318_v28  ;;  %v915_v10 = vrot.slane %v1906_v35, 1  ;;  %v1107_v2 = vadd.f32 %v1094_v38, %v1081_v40  ;;  %v1108_v39 = vadd.f32 %v1095_v54, %v1082_v48  ;;  %v2331_v28 = vld [vmem:[#allocation24_spill] sm:$0xff] }
  0xdd   :  { %v1947_v1 = vmin.f32 %v1892_v24, %v2319_v25  ;;  %v1952_v16 = vmin.f32 %v1897_v29, %v2320_v43  ;;  %v1109_v21 = vadd.f32 %v1096_v6, %v1083_v18  ;;  %v1110_v46 = vadd.f32 %v1097_v56, %v1084_v30  ;;  %v1279_v29 = vld [vmem:[%s2147_s2 + $0x7] ss:$0 sm:$0xff]  ;;  %v2325_v6 = vld [vmem:[#allocation18_spill] sm:$0xff]  ;;  %v2326_v56 = vld [vmem:[#allocation19_spill] sm:$0xff]  ;;  %s1031_s2 = scalar_select %p1030_p5, 1, 0 }
  0xde   :  { %v1111_v22 = vmin.f32 %v1098_v47, %v1102_v9  ;;  %v1955_v15 = vmin.f32 %v1018_v36, %v1019_v5  ;;  %v1112_v20 = vmin.f32 %v1099_v58, %v1103_v14  ;;  %v1113_v12 = vmin.f32 %v1100_v7, %v1104_v33  ;;  %v2327_v47 = vld [vmem:[#allocation20_spill] sm:$0xff]  ;;  %v2332_v25 = vld [vmem:[#allocation25_spill] sm:$0xff] }
  0xdf   :  { %v1114_v26 = vmin.f32 %v1101_v3, %v1105_v17  ;;  %1283 = vrsqrt.f32 %v1942_v61  ;;  %v1964_v5 = vmin.f32 %v1906_v35, %v915_v10  ;;  %v1148_v40 = vsub.f32 %v1436_v63, %v1279_v29  ;;  %v2333_v10 = vld [vmem:[#allocation26_spill] sm:$0xff] }
  0xe0   :  { %v1115_v24 = vmin.f32 %v1111_v22, %v1106_v41  ;;  %1285 = vrsqrt.f32 %v1947_v1  ;;  %v1116_v49 = vmin.f32 %v1112_v20, %v1107_v2  ;;  %v1117_v57 = vmin.f32 %v1113_v12, %v1108_v39  ;;  %v2334_v39 = vld [vmem:[#allocation27_spill] sm:$0xff] }
  0xe1   :  { %v1118_v23 = vmin.f32 %v1114_v26, %v1109_v21  ;;  %1287 = vrsqrt.f32 %v1952_v16  ;;  %v1021_v7 = vrot.slane %v1955_v15, 1  ;;  %v1149_v19 = vsub.f32 %v1439_v0, %v1279_v29 }
  0xe2   :  { %v1119_v45 = vmin.f32 %v1115_v24, %v1110_v46  ;;  %v1150_v36 = vsub.f32 %v2244_v62, %v1279_v29  ;;  %v1151_v8 = vsub.f32 %v2245_v60, %v1279_v29  ;;  %v1152_v35 = vsub.f32 %v2246_v51, %v1279_v29  ;;  %v2321_v62 = vld [vmem:[#allocation14_spill] sm:$0xff]  ;;  %v2322_v60 = vld [vmem:[#allocation15_spill] sm:$0xff]  ;;  %v2323_v51 = vld [vmem:[#allocation16_spill] sm:$0xff] }
  0xe3   :  { %v1121_v59 = vmin.f32 %v1117_v57, %v1118_v23  ;;  %v1153_v55 = vsub.f32 %v2247_v44, %v1279_v29  ;;  %v1154_v52 = vsub.f32 %v2248_v42, %v1279_v29  ;;  %v1155_v48 = vsub.f32 %v2249_v11, %v1279_v29  ;;  %v2324_v44 = vld [vmem:[#allocation17_spill] sm:$0xff] }
  0xe4   :  { %v1120_v13 = vmin.f32 %v1119_v45, %v1116_v49  ;;  %v1156_v63 = vsub.f32 %v2250_v31, %v1279_v29  ;;  %v1157_v4 = vsub.f32 %v2251_v37, %v1279_v29  ;;  %v1158_v50 = vsub.f32 %v2269_v27, %v1279_v29  ;;  %v2328_v37 = vld [vmem:[#allocation21_spill] sm:$0xff]  ;;  %v2329_v27 = vld [vmem:[#allocation22_spill] sm:$0xff] }
  0xe5   :  { %v1159_v32 = vsub.f32 %v2303_v34, %v1279_v29  ;;  %v1160_v18 = vsub.f32 %v2321_v62, %v1279_v29  ;;  %v1165_v30 = vsub.f32 %v2322_v60, %v1280_v53  ;;  %v1166_v38 = vsub.f32 %v2323_v51, %v1280_v53  ;;  %v2330_v34 = vld [vmem:[#allocation23_spill] sm:$0xff]  ;;  %v2335_v62 = vld [vmem:[#allocation4_spill] sm:$0xff] }
  0xe6   :  { %v1122_v0 = vmin.f32 %v1120_v13, %v1121_v59  ;;  %v1167_v54 = vsub.f32 %v2324_v44, %v1280_v53  ;;  %v1168_v11 = vsub.f32 %v2325_v6, %v1280_v53  ;;  %v1169_v31 = vsub.f32 %v2326_v56, %v1280_v53 }
  0xe7   :  { %v1170_v58 = vsub.f32 %v2327_v47, %v1280_v53  ;;  %v1171_v3 = vsub.f32 %v2328_v37, %v1280_v53  ;;  %v1172_v9 = vsub.f32 %v2329_v27, %v1280_v53  ;;  %v1173_v14 = vsub.f32 %v2330_v34, %v1280_v53 }
  0xe8   :  { %v1123_v42 = vrot.slane %v1122_v0, 4  ;;  %v1174_v33 = vsub.f32 %v2331_v28, %v1280_v53  ;;  %v1175_v43 = vsub.f32 %v2332_v25, %v1280_v53  ;;  %v1176_v2 = vsub.f32 %v2333_v10, %v1280_v53 }
  0xe9   :  { %v1993_v17 = vpop.eup %1283  ;;  %v1177_v21 = vsub.f32 %v2334_v39, %v1280_v53  ;;  %v1178_v22 = vmul.f32 %v1148_v40, %v1148_v40  ;;  %v1179_v20 = vmul.f32 %v1149_v19, %v1149_v19  ;;  %v1180_v12 = vmul.f32 %v1150_v36, %v1150_v36 }
  0xea   :  { %v1124_v41 = vmin.f32 %v1122_v0, %v1123_v42  ;;  %v1998_v46 = vpop.eup %1285  ;;  %v1181_v26 = vmul.f32 %v1151_v8, %v1151_v8  ;;  %v1182_v49 = vmul.f32 %v1152_v35, %v1152_v35  ;;  %v1183_v57 = vmul.f32 %v1153_v55, %v1153_v55 }
  0xeb   :  { %v2000_v24 = vpop.eup %1287  ;;  %v1184_v23 = vmul.f32 %v1154_v52, %v1154_v52  ;;  %v1185_v45 = vmul.f32 %v1155_v48, %v1155_v48  ;;  %v1186_v59 = vmul.f32 %v1156_v63, %v1156_v63  ;;  %v1187_v13 = vmul.f32 %v1157_v4, %v1157_v4 }
  0xec   :  { %v1125_v29 = vrot.slane %v1124_v41, 2  ;;  %v1188_v0 = vmul.f32 %v1158_v50, %v1158_v50  ;;  %vm495_vm1 = vcmp.eq.f32.partialorder %v2335_v62, inf  ;;  %v1189_v60 = vmul.f32 %v1159_v32, %v1159_v32 }
  0xed   :  { %v1191_v53 = vmul.f32 %v1165_v30, %v1165_v30  ;;  %v1192_v51 = vmul.f32 %v1166_v38, %v1166_v38  ;;  %v1193_v44 = vmul.f32 %v1167_v54, %v1167_v54  ;;  %v1194_v40 = vmul.f32 %v1168_v11, %v1168_v11 }
  0xee   :  { %v1195_v19 = vmul.f32 %v1169_v31, %v1169_v31  ;;  %v1196_v36 = vmul.f32 %v1170_v58, %v1170_v58  ;;  %v1197_v8 = vmul.f32 %v1171_v3, %v1171_v3  ;;  %v1126_v35 = vmin.f32 %v1124_v41, %v1125_v29  ;;  %v2336_v31 = vld [vmem:[#allocation5_spill] sm:$0xff] }
  0xef   :  { %v1190_v55 = vmul.f32 %v1160_v18, %v1160_v18  ;;  %v1198_v52 = vmul.f32 %v1172_v9, %v1172_v9  ;;  %v1199_v48 = vmul.f32 %v1173_v14, %v1173_v14  ;;  %v1200_v63 = vmul.f32 %v1174_v33, %v1174_v33 }
  0xf0   :  { %v1201_v4 = vmul.f32 %v1175_v43, %v1175_v43  ;;  %v1202_v50 = vmul.f32 %v1176_v2, %v1176_v2  ;;  %v1203_v32 = vmul.f32 %v1177_v21, %v1177_v21  ;;  %v1204_v30 = vadd.f32 %v1191_v53, %v1178_v22 }
  0xf1   :  { %v1205_v38 = vadd.f32 %v1192_v51, %v1179_v20  ;;  %v1206_v54 = vadd.f32 %v1193_v44, %v1180_v12  ;;  %v1207_v42 = vadd.f32 %v1194_v40, %v1181_v26  ;;  %v1208_v18 = vadd.f32 %v1195_v19, %v1182_v49 }
  0xf2   :  { %v1209_v6 = vadd.f32 %v1196_v36, %v1183_v57  ;;  %v1210_v11 = vadd.f32 %v1197_v8, %v1184_v23  ;;  %v1211_v56 = vadd.f32 %v1198_v52, %v1185_v45  ;;  %v494_v47 = vmul.f32 %v2336_v31, %v2335_v62 }
  0xf3   :  { %1289 = vrsqrt.f32 %v1964_v5  ;;  %v2021_v58 = vmin.f32 %v1955_v15, %v1021_v7  ;;  %v1127_v37 = vrot.slane %v1126_v35, 1  ;;  %v1212_v3 = vadd.f32 %v1199_v48, %v1186_v59 }
  0xf4   :  { %v1213_v27 = vadd.f32 %v1200_v63, %v1187_v13  ;;  %v1214_v9 = vadd.f32 %v1201_v4, %v1188_v0  ;;  %v1215_v34 = vadd.f32 %v1202_v50, %v1189_v60  ;;  %v1216_v14 = vadd.f32 %v1203_v32, %v1190_v55 }
  0xf5   :  { %v1217_v28 = vmin.f32 %v1204_v30, %v1208_v18  ;;  %v1218_v33 = vmin.f32 %v1205_v38, %v1209_v6  ;;  %v1219_v41 = vmin.f32 %v1206_v54, %v1210_v11  ;;  %vm497_vm2 = vcmp.eq.f32.partialorder %v2335_v62, 0.0 }
  0xf6   :  { %v502_v15 = vstv %s2013_s17  ;;  %v600_v7 = vmul.f32 %v1993_v17, %v1942_v61  ;;  %v1220_v25 = vmin.f32 %v1207_v42, %v1211_v56  ;;  %vm601_vm3 = vcmp.eq.f32.partialorder %v1942_v61, inf }
  0xf7   :  { %v1221_v43 = vmin.f32 %v1217_v28, %v1212_v3  ;;  %v1222_v10 = vmin.f32 %v1218_v33, %v1213_v27  ;;  %v1223_v2 = vmin.f32 %v1219_v41, %v1214_v9  ;;  %v496_v39 = vsel %vm495_vm1, %v2335_v62, %v494_v47 }
  0xf8   :  { %v498_v21 = vand.u32 2147483648, %v2335_v62  ;;  %v608_v22 = vstv %s2027_s20  ;;  %v1224_v20 = vmin.f32 %v1220_v25, %v1215_v34  ;;  %v604_v17 = vand.u32 2147483648, %v1942_v61 }
  0xf9   :  { %1291 = vrsqrt.f32 %v2021_v58  ;;  %v2047_v12 = vmin.f32 %v1126_v35, %v1127_v37  ;;  %v1225_v26 = vmin.f32 %v1221_v43, %v1216_v14  ;;  %v602_v29 = vsel %vm601_vm3, %v1942_v61, %v600_v7 }
  0xfa   :  { %vm603_vm4 = vcmp.eq.f32.partialorder %v1942_v61, 0.0  ;;  %v706_v49 = vmul.f32 %v1998_v46, %v1947_v1  ;;  %v1227_v57 = vmin.f32 %v1223_v2, %v1224_v20  ;;  %vm707_vm5 = vcmp.eq.f32.partialorder %v1947_v1, inf }
  0xfb   :  { %v1226_v23 = vmin.f32 %v1225_v26, %v1222_v10  ;;  %v499_v45 = vsel %vm497_vm2, %v498_v21, %v496_v39  ;;  %vm2060_vm6 = vcmp.eq.s32.totalorder %v502_v15, 1  ;;  %vm2064_vm7 = vcmp.eq.s32.totalorder %v608_v22, 1 }
  0xfc   :  { %v605_v13 = vsel %vm603_vm4, %v604_v17, %v602_v29  ;;  %v710_v0 = vand.u32 2147483648, %v1947_v1  ;;  %1293 = vrsqrt.f32 %v2047_v12  ;;  %v708_v60 = vsel %vm707_vm5, %v1947_v1, %v706_v49 }
  0xfd   :  { %v1290_v46 = vpop.eup %1289  ;;  %v1228_v62 = vmin.f32 %v1226_v23, %v1227_v57  ;;  %vm709_vm8 = vcmp.eq.f32.partialorder %v1947_v1, 0.0  ;;  %v714_v53 = vstv %s713_s27  ;;  %v812_v51 = vmul.f32 %v2000_v24, %v1952_v16 }
  0xfe   :  { %vm813_vm9 = vcmp.eq.f32.partialorder %v1952_v16, inf  ;;  %v504_v40 = vsel %vm2060_vm6, %v499_v45, 0.0  ;;  %v610_v19 = vsel %vm2064_vm7, %v605_v13, 0.0  ;;  %v711_v36 = vsel %vm709_vm8, %v710_v0, %v708_v60 }
  0xff   :  { %v1229_v44 = vrot.slane %v1228_v62, 4  ;;  %vm2086_vm10 = vcmp.eq.s32.totalorder %v714_v53, 1  ;;  %v816_v24 = vand.u32 2147483648, %v1952_v16  ;;  %v814_v35 = vsel %vm813_vm9, %v1952_v16, %v812_v51 }
 0x100   :  { %vm815_vm11 = vcmp.eq.f32.partialorder %v1952_v16, 0.0  ;;  %v820_v55 = vstv %s819_s30  ;;  %v918_v52 = vmul.f32 %v1290_v46, %v1964_v5  ;;  %v611_v63 = vadd.f32 %v610_v19, %v504_v40 }
 0x101   :  { %v1230_v8 = vmin.f32 %v1228_v62, %v1229_v44  ;;  %vm919_vm12 = vcmp.eq.f32.partialorder %v1964_v5, inf  ;;  %v716_v50 = vsel %vm2086_vm10, %v711_v36, 0.0  ;;  %v817_v32 = vsel %vm815_vm11, %v816_v24, %v814_v35 }
 0x102   :  { %vm2104_vm13 = vcmp.eq.s32.totalorder %v820_v55, 1  ;;  %v922_v16 = vand.u32 2147483648, %v1964_v5  ;;  %v920_v54 = vsel %vm919_vm12, %v1964_v5, %v918_v52  ;;  %vm921_vm14 = vcmp.eq.f32.partialorder %v1964_v5, 0.0 }
 0x103   :  { %v1292_v48 = vpop.eup %1291  ;;  %v1231_v4 = vrot.slane %v1230_v8, 2  ;;  %v926_v42 = vstv %s925_s9  ;;  %v717_v11 = vadd.f32 %v716_v50, %v611_v63  ;;  %vm1025_vm15 = vcmp.eq.f32.partialorder %v2021_v58, inf }
 0x104   :  { %v1024_v18 = vmul.f32 %v1292_v48, %v2021_v58  ;;  %v822_v31 = vsel %vm2104_vm13, %v817_v32, 0.0  ;;  %v923_v47 = vsel %vm921_vm14, %v922_v16, %v920_v54  ;;  %vm2122_vm0 = vcmp.eq.s32.totalorder %v926_v42, 1 }
 0x105   :  { %v1232_v38 = vmin.f32 %v1230_v8, %v1231_v4  ;;  %v1028_v5 = vand.u32 2147483648, %v2021_v58  ;;  %vm1027_vm1 = vcmp.eq.f32.partialorder %v2021_v58, 0.0  ;;  %v1032_v9 = vstv %s1031_s2 }
 0x106   :  { %v1294_v6 = vpop.eup %1293  ;;  %v1026_v27 = vsel %vm1025_vm15, %v2021_v58, %v1024_v18  ;;  %v823_v14 = vadd.f32 %v822_v31, %v717_v11  ;;  %vm1131_vm2 = vcmp.eq.f32.partialorder %v2047_v12, inf  ;;  %v928_v28 = vsel %vm2122_vm0, %v923_v47, 0.0 }
 0x107   :  { %v1233_v56 = vrot.slane %v1232_v38, 1  ;;  %v1130_v34 = vmul.f32 %v1294_v6, %v2047_v12  ;;  %v1029_v58 = vsel %vm1027_vm1, %v1028_v5, %v1026_v27  ;;  %vm1033_vm3 = vcmp.eq.s32.totalorder %v1032_v9, 1 }
 0x108   :  { %v1134_v33 = vand.u32 2147483648, %v2047_v12  ;;  %vm1133_vm4 = vcmp.eq.f32.partialorder %v2047_v12, 0.0  ;;  %v1138_v15 = vstv %s1137_s16  ;;  %v929_v7 = vadd.f32 %v928_v28, %v823_v14 }
 0x109   :  { %v1234_v3 = vmin.f32 %v1232_v38, %v1233_v56  ;;  %v1132_v41 = vsel %vm1131_vm2, %v2047_v12, %v1130_v34  ;;  %v1034_v25 = vsel %vm1033_vm3, %v1029_v58, 0.0  ;;  %vm1139_vm5 = vcmp.eq.s32.totalorder %v1138_v15, 1 }
 0x10a   :  { %v1135_v43 = vsel %vm1133_vm4, %v1134_v33, %v1132_v41  ;;  %v1035_v10 = vadd.f32 %v1034_v25, %v929_v7  ;;  %v1244_v39 = vstv %s1243_s19 }
 0x10b   :  { %1295 = vrsqrt.f32 %v1234_v3  ;;  %v1140_v2 = vsel %vm1139_vm5, %v1135_v43, 0.0  ;;  %vm1237_vm6 = vcmp.eq.f32.partialorder %v1234_v3, inf  ;;  %v1240_v22 = vand.u32 2147483648, %v1234_v3 }
 0x10c   :  { %vm1239_vm7 = vcmp.eq.f32.partialorder %v1234_v3, 0.0  ;;  %v1141_v17 = vadd.f32 %v1140_v2, %v1035_v10  ;;  %vm1245_vm8 = vcmp.eq.s32.totalorder %v1244_v39, 1 }
 0x115   :  { %v1296_v21 = vpop.eup %1295 }
 0x116   :  { %v1236_v20 = vmul.f32 %v1296_v21, %v1234_v3 }
 0x118   :  { %v1238_v26 = vsel %vm1237_vm6, %v1234_v3, %v1236_v20 }
 0x119   :  { %v1241_v29 = vsel %vm1239_vm7, %v1240_v22, %v1238_v26 }
 0x11a   :  { %v1246_v49 = vsel %vm1245_vm8, %v1241_v29, 0.0 }
 0x11b   :  { %v1247_v12 = vadd.f32 %v1246_v49, %v1141_v17 }
 0x11d   :  { %1248 = vst [vmem:[%s2149_s3] sm:$0x1] %v1247_v12 }

</bundles_post_ra>
